<compile_context>
chip_gen: v6e
topology: v6e:2x2x1
jax: 0.10.0
libtpu: 0.0.40
codegen_flags: <defaults>
</compile_context>

<pallas_src>
import functools

import numpy as np
import jax
import jax.numpy as jnp
from jax.experimental import pallas as pl
from jax.experimental.pallas import tpu as pltpu

_EPS = float(np.finfo(np.float64).eps)  # sonopy safe_log clip value


def _round_up(x, m):
    return (x + m - 1) // m * m


# ---------------- parameter construction (deterministic, plain numpy glue) --------

def _hertz_to_mels(f):
    return 1127.0 * np.log(1.0 + f / 700.0)


def _mels_to_hertz(m):
    return 700.0 * (np.exp(m / 1127.0) - 1.0)


def _filterbanks(sample_rate, num_filt, fft_len):
    """Triangular mel filterbank, (num_filt, fft_len), exactly as in sonopy."""
    grid_mels = np.linspace(_hertz_to_mels(0.0), _hertz_to_mels(sample_rate),
                            num_filt + 2, True)
    grid_hertz = _mels_to_hertz(grid_mels)
    grid_indices = (grid_hertz * fft_len / sample_rate).astype(int)
    banks = np.zeros([num_filt, fft_len], dtype=np.float32)
    for i, (left, middle, right) in enumerate(
            zip(grid_indices, grid_indices[1:], grid_indices[2:])):
        banks[i, left:middle] = np.linspace(0., 1., middle - left, False)
        banks[i, middle:right] = np.linspace(1., 0., right - middle, False)
    return banks


def _dct_ortho_matrix(n):
    """DCT-II with norm='ortho' as a right-multiplied matrix: y = x @ D, D (n, n)."""
    j = np.arange(n)[:, None].astype(np.float64)
    k = np.arange(n)[None, :].astype(np.float64)
    d = 2.0 * np.cos(np.pi * k * (2.0 * j + 1.0) / (2.0 * n))
    scale = np.full((1, n), np.sqrt(1.0 / (2.0 * n)))
    scale[0, 0] = np.sqrt(1.0 / (4.0 * n))
    return (d * scale).astype(np.float32)


def _build_constants(sample_rate, window, fft_size, num_filt, num_coeffs):
    n_bins = fft_size // 2 + 1
    n_bins_pad = _round_up(n_bins, 128)   # 201 -> 256: lane-aligned re/im split
    c_pad = _round_up(num_coeffs, 128)    # 40  -> 128: tile-aligned in-kernel transpose

    # Fused [cos | -sin] DFT matrix with 1/sqrt(fft_size) folded in, so that
    # re^2 + im^2 directly yields |rfft|^2 / fft_size.
    n = np.arange(window)[:, None].astype(np.float64)
    k = np.arange(n_bins)[None, :].astype(np.float64)
    ang = 2.0 * np.pi * n * k / float(fft_size)
    scale = 1.0 / np.sqrt(float(fft_size))
    w = np.zeros((window, 2 * n_bins_pad), np.float32)
    w[:, :n_bins] = np.cos(ang) * scale
    w[:, n_bins_pad:n_bins_pad + n_bins] = -np.sin(ang) * scale

    # Mel filterbank (transposed) + ones column: last column of powers @ mel
    # equals sum(powers) -> frame energy via the same MXU matmul.
    fb = _filterbanks(sample_rate, num_filt, n_bins)          # (num_filt, n_bins)
    mel = np.zeros((n_bins_pad, num_filt + 1), np.float32)
    mel[:n_bins, :num_filt] = fb.T
    mel[:n_bins, num_filt] = 1.0

    # DCT-II (ortho) with coefficient-0 column replaced by routing of the
    # log-energy row (so no in-kernel select is needed).
    d = _dct_ortho_matrix(num_filt)[:, :num_coeffs]           # (num_filt, num_coeffs)
    dct = np.zeros((num_filt + 1, c_pad), np.float32)
    dct[:num_filt, 1:num_coeffs] = d[:, 1:]
    dct[num_filt, 0] = 1.0

    return (jnp.asarray(w, jnp.bfloat16), jnp.asarray(mel, jnp.float32),
            jnp.asarray(dct, jnp.float32), n_bins_pad, c_pad)


# ------------------------------- Pallas kernel -------------------------------------

def _mfcc_kernel(frames_ref, w_ref, mel_ref, dct_ref, out_ref, *,
                 n_bins_pad, num_coeffs, eps):
    # rfft as one fused bf16 MXU matmul (re | im), f32 accumulation.
    spec = jnp.dot(frames_ref[...], w_ref[...],
                   preferred_element_type=jnp.float32)          # (tile_t, 2*n_bins_pad)
    sq = spec * spec
    powers = sq[:, :n_bins_pad] + sq[:, n_bins_pad:]            # (tile_t, n_bins_pad)
    # mel filterbank (+ frame energy in the last column), then safe_log (EUP).
    mels_e = jnp.dot(powers, mel_ref[...],
                     preferred_element_type=jnp.float32)        # (tile_t, num_filt+1)
    logm = jnp.log(jnp.maximum(mels_e, eps))
    # DCT-II (ortho); log-energy is routed to coefficient 0 by the matrix itself.
    mfcc = jnp.dot(logm, dct_ref[...],
                   preferred_element_type=jnp.float32)          # (tile_t, c_pad)
    # Lane-dense (num_coeffs, tile_t) store via a tile-aligned XLU transpose.
    out_ref[...] = mfcc.T[:num_coeffs, :].astype(out_ref.dtype)


def _mfcc_forward(x, w, mel, dct, *, window, hop, num_coeffs,
                  n_bins_pad, c_pad, max_tile_t, eps):
    audio = jnp.reshape(x, (-1,)).astype(jnp.bfloat16)
    n = audio.shape[0]
    if n < window:
        raise ValueError("audio shorter than one window")
    num_frames = (n - window) // hop + 1
    n_parts = window // hop                       # 2 for the default (400, 200)

    tile_t = min(max_tile_t, _round_up(num_frames, 128))
    t_pad = _round_up(num_frames, tile_t)
    padded_len = (t_pad - 1) * hop + window
    audio_pad = jnp.pad(audio, (0, padded_len - n))

    # Gather-free framing: frame t = [chunk_t, ..., chunk_{t+n_parts-1}].
    views = [audio_pad[r * hop: r * hop + t_pad * hop].reshape(t_pad, hop)
             for r in range(n_parts)]
    frames = views[0] if n_parts == 1 else jnp.concatenate(views, axis=1)  # (t_pad, window)

    n_blocks = t_pad // tile_t
    num_filt1 = mel.shape[1]

    kernel = functools.partial(_mfcc_kernel, n_bins_pad=n_bins_pad,
                               num_coeffs=num_coeffs, eps=eps)
    out = pl.pallas_call(
        kernel,
        out_shape=jax.ShapeDtypeStruct((num_coeffs, t_pad), jnp.float32),
        grid=(n_blocks,),
        in_specs=[
            pl.BlockSpec((tile_t, window), lambda i: (i, 0)),            # frames (pipelined)
            pl.BlockSpec((window, 2 * n_bins_pad), lambda i: (0, 0)),    # fused DFT matrix
            pl.BlockSpec((n_bins_pad, num_filt1), lambda i: (0, 0)),     # mel (+energy col)
            pl.BlockSpec((num_filt1, c_pad), lambda i: (0, 0)),          # dct (+energy route)
        ],
        out_specs=pl.BlockSpec((num_coeffs, tile_t), lambda i: (0, i)),
        compiler_params=pltpu.CompilerParams(
            dimension_semantics=("parallel",)),
    )(frames, w, mel, dct)

    return out[:, :num_frames][None]              # (1, num_coeffs, num_frames)


class MFCC:
    """JAX/Pallas equivalent of the PyTorch MFCC module (sonopy mfcc_spec)."""

    def __init__(self, sample_rate, fft_size=400, window_stride=(400, 200),
                 num_filt=40, num_coeffs=40, max_tile_t=512):
        self.sample_rate = sample_rate
        self.window_stride = window_stride
        self.fft_size = fft_size
        self.num_filt = num_filt
        self.num_coeffs = num_coeffs
        window, hop = window_stride
        # TODO(synk): gather-free chunked framing assumes window % hop == 0 (true for
        # the module default (400, 200)); other ratios would need in-kernel DMA assembly.
        assert window % hop == 0, "window must be a multiple of hop"
        w, mel, dct, n_bins_pad, c_pad = _build_constants(
            sample_rate, window, fft_size, num_filt, num_coeffs)
        self._w, self._mel, self._dct = w, mel, dct
        self._fwd = jax.jit(functools.partial(
            _mfcc_forward, window=window, hop=hop, num_coeffs=num_coeffs,
            n_bins_pad=n_bins_pad, c_pad=c_pad, max_tile_t=max_tile_t, eps=_EPS))

    def __call__(self, x):
        # x: (1, num_samples)  ->  (1, num_coeffs, num_frames)
        return self._fwd(jnp.asarray(x, jnp.float32), self._w, self._mel, self._dct)


if __name__ == "__main__":
    key = jax.random.PRNGKey(0)
    sample_rate = 8000
    num_samples = 2000                      # small: 9 frames of 400 with hop 200
    x = jax.random.normal(key, (1, num_samples), dtype=jnp.float32)

    module = MFCC(sample_rate)              # defaults: fft 400, (400, 200), 40, 40
    y = jax.block_until_ready(module(x))

    expected_frames = (num_samples - 400) // 200 + 1
    assert y.shape == (1, 40, expected_frames), y.shape
    assert y.dtype == jnp.float32, y.dtype
    assert bool(jnp.all(jnp.isfinite(y)))
    print("KERNEL_OK")
</pallas_src>

<mosaic_0001>
module attributes {stable_mosaic.version = 11 : i64} {
  func.func @_mfcc_kernel(%arg0: i32, %arg1: memref<128x400xbf16, #tpu.memory_space<vmem>>, %arg2: memref<400x512xbf16, #tpu.memory_space<vmem>>, %arg3: memref<256x41xf32, #tpu.memory_space<vmem>>, %arg4: memref<41x128xf32, #tpu.memory_space<vmem>>, %arg5: memref<40x128xf32, #tpu.memory_space<vmem>>) attributes {dimension_semantics = [#tpu.dimension_semantics<parallel>], iteration_bounds = array<i64: 1>, scalar_prefetch = 0 : i64, scratch_operands = 0 : i64, tpu.core_type = #tpu.core_type<tc>, window_params = [{transform_indices = @transform_0, window_bounds = array<i64: 128, 400>}, {pipeline_mode = #tpu.pipeline_mode<synchronous>, transform_indices = @transform_1, window_bounds = array<i64: 400, 512>}, {pipeline_mode = #tpu.pipeline_mode<synchronous>, transform_indices = @transform_2, window_bounds = array<i64: 256, 41>}, {pipeline_mode = #tpu.pipeline_mode<synchronous>, transform_indices = @transform_3, window_bounds = array<i64: 41, 128>}, {transform_indices = @transform_4, window_bounds = array<i64: 40, 128>}]} {
    %c0 = arith.constant 0 : index
    %c0_0 = arith.constant 0 : index
    %0 = vector.load %arg1[%c0, %c0_0] : memref<128x400xbf16, #tpu.memory_space<vmem>>, vector<128x400xbf16>
    %c0_1 = arith.constant 0 : index
    %c0_2 = arith.constant 0 : index
    %1 = vector.load %arg2[%c0_1, %c0_2] : memref<400x512xbf16, #tpu.memory_space<vmem>>, vector<400x512xbf16>
    %cst = arith.constant dense<0.000000e+00> : vector<128x512xf32>
    %2 = tpu.matmul %0, %1, %cst {dimension_numbers = #tpu.dot_dimension_numbers<[1], [0], [0], [1], [0, 0, 1, 1], [], []>} : vector<128x400xbf16>, vector<400x512xbf16>, vector<128x512xf32> -> vector<128x512xf32>
    %3 = arith.mulf %2, %2 : vector<128x512xf32>
    %4 = vector.extract_strided_slice %3 {offsets = [0, 0], sizes = [128, 256], strides = [1, 1]} : vector<128x512xf32> to vector<128x256xf32>
    %5 = vector.extract_strided_slice %3 {offsets = [0, 256], sizes = [128, 256], strides = [1, 1]} : vector<128x512xf32> to vector<128x256xf32>
    %6 = arith.addf %4, %5 : vector<128x256xf32>
    %c0_3 = arith.constant 0 : index
    %c0_4 = arith.constant 0 : index
    %7 = vector.load %arg3[%c0_3, %c0_4] : memref<256x41xf32, #tpu.memory_space<vmem>>, vector<256x41xf32>
    %cst_5 = arith.constant dense<0.000000e+00> : vector<128x41xf32>
    %8 = tpu.matmul %6, %7, %cst_5 {dimension_numbers = #tpu.dot_dimension_numbers<[1], [0], [0], [1], [0, 0, 1, 1], [], []>} : vector<128x256xf32>, vector<256x41xf32>, vector<128x41xf32> -> vector<128x41xf32>
    %cst_6 = arith.constant 2.22044605E-16 : f32
    %9 = vector.broadcast %cst_6 : f32 to vector<128x41xf32>
    %10 = arith.maximumf %8, %9 : vector<128x41xf32>
    %11 = math.log %10 : vector<128x41xf32>
    %c0_7 = arith.constant 0 : index
    %c0_8 = arith.constant 0 : index
    %12 = vector.load %arg4[%c0_7, %c0_8] : memref<41x128xf32, #tpu.memory_space<vmem>>, vector<41x128xf32>
    %cst_9 = arith.constant dense<0.000000e+00> : vector<128x128xf32>
    %13 = tpu.matmul %11, %12, %cst_9 {dimension_numbers = #tpu.dot_dimension_numbers<[1], [0], [0], [1], [0, 0, 1, 1], [], []>} : vector<128x41xf32>, vector<41x128xf32>, vector<128x128xf32> -> vector<128x128xf32>
    %14 = tpu.transpose %13, [1, 0] : vector<128x128xf32> -> vector<128x128xf32>
    %15 = vector.extract_strided_slice %14 {offsets = [0, 0], sizes = [40, 128], strides = [1, 1]} : vector<128x128xf32> to vector<40x128xf32>
    %c0_10 = arith.constant 0 : index
    %c0_11 = arith.constant 0 : index
    %16 = vector.load %arg5[%c0_10, %c0_11] : memref<40x128xf32, #tpu.memory_space<vmem>>, vector<40x128xf32>
    tpu.vector_store %arg5[%c0_10, %c0_11], %15 {strides = array<i32>} : memref<40x128xf32, #tpu.memory_space<vmem>>, vector<40x128xf32>,
    return
  }
  func.func @transform_0(%arg0: i32) -> (i32, i32) {
    %c0_i32 = arith.constant 0 : i32
    %c0_i32_0 = arith.constant 0 : i32
    return %arg0, %c0_i32 : i32, i32
  }
  func.func @transform_1(%arg0: i32) -> (i32, i32) {
    %c0_i32 = arith.constant 0 : i32
    %c0_i32_0 = arith.constant 0 : i32
    %c0_i32_1 = arith.constant 0 : i32
    return %c0_i32, %c0_i32_0 : i32, i32
  }
  func.func @transform_2(%arg0: i32) -> (i32, i32) {
    %c0_i32 = arith.constant 0 : i32
    %c0_i32_0 = arith.constant 0 : i32
    %c0_i32_1 = arith.constant 0 : i32
    return %c0_i32, %c0_i32_0 : i32, i32
  }
  func.func @transform_3(%arg0: i32) -> (i32, i32) {
    %c0_i32 = arith.constant 0 : i32
    %c0_i32_0 = arith.constant 0 : i32
    %c0_i32_1 = arith.constant 0 : i32
    return %c0_i32, %c0_i32_0 : i32, i32
  }
  func.func @transform_4(%arg0: i32) -> (i32, i32) {
    %c0_i32 = arith.constant 0 : i32
    %c0_i32_0 = arith.constant 0 : i32
    return %c0_i32, %arg0 : i32, i32
  }
}

</mosaic_0001>

<bundles_post_ra>
// kernel: _mfcc_forward.1
= control target key start
LH: loop header
LB: loop body
LE: loop exit
PB: predicated region body
PF: predicated region fallthrough
CT: control target
= control target key end

     0   :  { %vm802_vm0 = vcmask 130048   ;;  %vm1655_vm1 = vcmask 1040384   ;;  %vm1606_vm2 = vcmask 334848   ;;  %s3221_s1 = inlined_call_operand.vmem [shape: bf16[400,512], index: 1, kind: input, shape index: {}]   ;;  %s3222_s0 = inlined_call_operand.vmem [shape: bf16[128,400], index: 0, kind: input, shape index: {}]   ;;  %s3223_s2 = inlined_call_operand.vmem [shape: f32[256,41], index: 2, kind: input, shape index: {}]   ;;  %s3224_s3 = inlined_call_operand.vmem [shape: f32[41,128], index: 3, kind: input, shape index: {}]   ;;  %s3225_s4 = inlined_call_operand.vmem [shape: f32[40,128], index: 4, kind: output, shape index: {}]  }
   0x1   :  { %v2148_v0 = vld [vmem:[%s3221_s1 + $0xe4] ss:$16 sps:$4 sm:$0xff]   ;;  %v2150_v1 = vld [vmem:[%s3221_s1 + $0xe0] ss:$16 sps:$4 sm:$0xff]   ;;  %v2508_v34 = vld [vmem:[%s3222_s0 + $0xc] ss:$16 sps:$4 sm:$0xff]  }
   0x2   :  { %827 = vmatprep.subr.bf16.mxu0 %v2148_v0  ;;  %v2151_v2 = vld [vmem:[%s3221_s1 + $0xc4] ss:$16 sps:$4 sm:$0xff]   ;;  %v2153_v3 = vld [vmem:[%s3221_s1 + $0xc0] ss:$16 sps:$4 sm:$0xff]   ;;  %1977 = vmatprep.mubr.msk.bf16.mxu1 %vm802_vm0, %v2508_v34  ;;  %v2225_v43 = vld [vmem:[%s3221_s1 + $0xec] ss:$16 sps:$4 sm:$0xff]  }
   0x3   :  { %828 = vmatpush1.bf16.msra.mxu0 %v2150_v1  ;;  %v2154_v4 = vld [vmem:[%s3221_s1 + $0xa4] ss:$16 sps:$4 sm:$0xff]   ;;  %v2156_v5 = vld [vmem:[%s3221_s1 + $0xa0] ss:$16 sps:$4 sm:$0xff]   ;;  %v2551_v46 = vld [vmem:[%s3222_s0 + $0x8] ss:$16 sps:$4 sm:$0xff]  }
   0x4   :  { %829 = vmatprep.subr.bf16.mxu0 %v2151_v2  ;;  %v2157_v6 = vld [vmem:[%s3221_s1 + $0x84] ss:$16 sps:$4 sm:$0xff]   ;;  %v2159_v8 = vld [vmem:[%s3221_s1 + $0x80] ss:$16 sps:$4 sm:$0xff]   ;;  %v2223_v47 = vld [vmem:[%s3221_s1 + $0xe8] ss:$16 sps:$4 sm:$0xff]  }
   0x5   :  { %v2166_v7 = vld [vmem:[%s3221_s1 + $0x2e4] ss:$16 sps:$4 sm:$0xff]   ;;  %v2170_v9 = vld [vmem:[%s3221_s1 + $0x2e0] ss:$16 sps:$4 sm:$0xff]   ;;  %v2234_v48 = vld [vmem:[%s3221_s1 + $0xcc] ss:$16 sps:$4 sm:$0xff]  }
   0x6   :  { %940 = vmatprep.subr.bf16.mxu1 %v2166_v7  ;;  %v2172_v10 = vld [vmem:[%s3221_s1 + $0x2c4] ss:$16 sps:$4 sm:$0xff]   ;;  %v2176_v12 = vld [vmem:[%s3221_s1 + $0x2c0] ss:$16 sps:$4 sm:$0xff]   ;;  %v2562_v49 = vld [vmem:[%s3222_s0 + $0x2c] ss:$16 sps:$4 sm:$0xff]  }
   0x7   :  { %830 = vmatpush1.bf16.msra.mxu0 %v2153_v3  ;;  %v2160_v11 = vld [vmem:[%s3221_s1 + $0x64] ss:$16 sps:$4 sm:$0xff]   ;;  %941 = vmatpush1.bf16.msra.mxu1 %v2170_v9  ;;  %v2162_v14 = vld [vmem:[%s3221_s1 + $0x60] ss:$16 sps:$4 sm:$0xff]   ;;  %v2232_v52 = vld [vmem:[%s3221_s1 + $0xc8] ss:$16 sps:$4 sm:$0xff]  }
   0x8   :  { %831 = vmatprep.subr.bf16.mxu0 %v2154_v4  ;;  %942 = vmatprep.subr.bf16.mxu1 %v2172_v10  ;;  %v2178_v13 = vld [vmem:[%s3221_s1 + $0x2a4] ss:$16 sps:$4 sm:$0xff]   ;;  %v2182_v16 = vld [vmem:[%s3221_s1 + $0x2a0] ss:$16 sps:$4 sm:$0xff]   ;;  %v2243_v53 = vld [vmem:[%s3221_s1 + $0xac] ss:$16 sps:$4 sm:$0xff]  }
   0x9   :  { %v2163_v15 = vld [vmem:[%s3221_s1 + $0x44] ss:$16 sps:$4 sm:$0xff]   ;;  %v2165_v18 = vld [vmem:[%s3221_s1 + $0x40] ss:$16 sps:$4 sm:$0xff]   ;;  %v2588_v56 = vld [vmem:[%s3222_s0 + $0x28] ss:$16 sps:$4 sm:$0xff]  }
   0xa   :  { %v2184_v17 = vld [vmem:[%s3221_s1 + $0x284] ss:$16 sps:$4 sm:$0xff]   ;;  %v2188_v20 = vld [vmem:[%s3221_s1 + $0x280] ss:$16 sps:$4 sm:$0xff]   ;;  %v2241_v57 = vld [vmem:[%s3221_s1 + $0xa8] ss:$16 sps:$4 sm:$0xff]  }
   0xb   :  { %832 = vmatpush1.bf16.msra.mxu0 %v2156_v5  ;;  %943 = vmatpush1.bf16.msra.mxu1 %v2176_v12  ;;  %v2168_v19 = vld [vmem:[%s3221_s1 + $0x24] ss:$16 sps:$4 sm:$0xff]   ;;  %v2171_v22 = vld [vmem:[%s3221_s1 + $0x20] ss:$16 sps:$4 sm:$0xff]   ;;  %v2248_v58 = vld [vmem:[%s3221_s1 + $0x8c] ss:$16 sps:$4 sm:$0xff]  }
   0xc   :  { %833 = vmatprep.subr.bf16.mxu0 %v2157_v6  ;;  %944 = vmatprep.subr.bf16.mxu1 %v2178_v13  ;;  %v2190_v21 = vld [vmem:[%s3221_s1 + $0x264] ss:$16 sps:$4 sm:$0xff]   ;;  %v2194_v24 = vld [vmem:[%s3221_s1 + $0x260] ss:$16 sps:$4 sm:$0xff]   ;;  %v2599_v59 = vld [vmem:[%s3222_s0 + $0x4c] ss:$16 sps:$4 sm:$0xff]  }
   0xd   :  { %v2174_v23 = vld [vmem:[%s3221_s1 + $0x4] ss:$16 sps:$4 sm:$0xff]   ;;  %v2177_v26 = vld [vmem:[%s3221_s1] ss:$16 sps:$4 sm:$0xff]   ;;  %v2246_v62 = vld [vmem:[%s3221_s1 + $0x88] ss:$16 sps:$4 sm:$0xff]  }
   0xe   :  { %v2196_v25 = vld [vmem:[%s3221_s1 + $0x244] ss:$16 sps:$4 sm:$0xff]   ;;  %v2200_v28 = vld [vmem:[%s3221_s1 + $0x240] ss:$16 sps:$4 sm:$0xff]   ;;  %v2258_v63 = vld [vmem:[%s3221_s1 + $0x6c] ss:$16 sps:$4 sm:$0xff]  }
   0xf   :  { %834 = vmatpush1.bf16.msra.mxu0 %v2159_v8  ;;  %945 = vmatpush1.bf16.msra.mxu1 %v2182_v16  ;;  %v2180_v27 = vld [vmem:[%s3221_s1 + $0x1e4] ss:$16 sps:$4 sm:$0xff]   ;;  %v2183_v30 = vld [vmem:[%s3221_s1 + $0x1e0] ss:$16 sps:$4 sm:$0xff]   ;;  %v2237_v1 = vld [vmem:[%s3221_s1 + $0x2ec] ss:$16 sps:$4 sm:$0xff]  }
  0x10   :  { %835 = vmatprep.subr.bf16.mxu0 %v2160_v11  ;;  %946 = vmatprep.subr.bf16.mxu1 %v2184_v17  ;;  %v2202_v29 = vld [vmem:[%s3221_s1 + $0x224] ss:$16 sps:$4 sm:$0xff]   ;;  %v2206_v32 = vld [vmem:[%s3221_s1 + $0x220] ss:$16 sps:$4 sm:$0xff]   ;;  %v2625_v2 = vld [vmem:[%s3222_s0 + $0x48] ss:$16 sps:$4 sm:$0xff]  }
  0x11   :  { %v2186_v31 = vld [vmem:[%s3221_s1 + $0x1c4] ss:$16 sps:$4 sm:$0xff]   ;;  %v2189_v35 = vld [vmem:[%s3221_s1 + $0x1c0] ss:$16 sps:$4 sm:$0xff]   ;;  %v2256_v3 = vld [vmem:[%s3221_s1 + $0x68] ss:$16 sps:$4 sm:$0xff]  }
  0x12   :  { %v2208_v33 = vld [vmem:[%s3221_s1 + $0x204] ss:$16 sps:$4 sm:$0xff]   ;;  %v2212_v37 = vld [vmem:[%s3221_s1 + $0x200] ss:$16 sps:$4 sm:$0xff]   ;;  %v2263_v4 = vld [vmem:[%s3221_s1 + $0x4c] ss:$16 sps:$4 sm:$0xff]  }
  0x13   :  { %836 = vmatpush1.bf16.msra.mxu0 %v2162_v14  ;;  %947 = vmatpush1.bf16.msra.mxu1 %v2188_v20  ;;  %v2192_v36 = vld [vmem:[%s3221_s1 + $0x1a4] ss:$16 sps:$4 sm:$0xff]   ;;  %v2195_v40 = vld [vmem:[%s3221_s1 + $0x1a0] ss:$16 sps:$4 sm:$0xff]   ;;  %v2636_v5 = vld [vmem:[%s3222_s0 + $0x6c] ss:$16 sps:$4 sm:$0xff]  }
  0x14   :  { %837 = vmatprep.subr.bf16.mxu0 %v2163_v15  ;;  %948 = vmatprep.subr.bf16.mxu1 %v2190_v21  ;;  %v2214_v38 = vld [vmem:[%s3221_s1 + $0x304] ss:$16 sps:$4 sm:$0xff]   ;;  %v2218_v42 = vld [vmem:[%s3221_s1 + $0x300] ss:$16 sps:$4 sm:$0xff]   ;;  %v2235_v7 = vld [vmem:[%s3221_s1 + $0x2e8] ss:$16 sps:$4 sm:$0xff]  }
  0x15   :  { %v2527_v39 = vld [vmem:[%s3222_s0 + $0x4] ss:$16 sps:$4 sm:$0xff]   ;;  %v2201_v44 = vld [vmem:[%s3221_s1 + $0x180] ss:$16 sps:$4 sm:$0xff]   ;;  %v2252_v9 = vld [vmem:[%s3221_s1 + $0x2cc] ss:$16 sps:$4 sm:$0xff]  }
  0x16   :  { %v2198_v41 = vld [vmem:[%s3221_s1 + $0x184] ss:$16 sps:$4 sm:$0xff]   ;;  %859 = vmatprep.mubr.bf16.mxu0 %v2527_v39  ;;  %v2207_v50 = vld [vmem:[%s3221_s1 + $0x160] ss:$16 sps:$4 sm:$0xff]   ;;  %v2261_v10 = vld [vmem:[%s3221_s1 + $0x48] ss:$16 sps:$4 sm:$0xff]  }
  0x17   :  { %838 = vmatpush1.bf16.msra.mxu0 %v2165_v18  ;;  %949 = vmatpush1.bf16.msra.mxu1 %v2194_v24  ;;  %v2204_v45 = vld [vmem:[%s3221_s1 + $0x164] ss:$16 sps:$4 sm:$0xff]   ;;  %v2213_v54 = vld [vmem:[%s3221_s1 + $0x140] ss:$16 sps:$4 sm:$0xff]   ;;  %v2273_v11 = vld [vmem:[%s3221_s1 + $0x2c] ss:$16 sps:$4 sm:$0xff]  }
  0x18   :  { %839 = vmatprep.subr.bf16.mxu0 %v2168_v19  ;;  %950 = vmatprep.subr.bf16.mxu1 %v2196_v25  ;;  %v2210_v51 = vld [vmem:[%s3221_s1 + $0x144] ss:$16 sps:$4 sm:$0xff]   ;;  %v2219_v60 = vld [vmem:[%s3221_s1 + $0x120] ss:$16 sps:$4 sm:$0xff]   ;;  %v2250_v12 = vld [vmem:[%s3221_s1 + $0x2c8] ss:$16 sps:$4 sm:$0xff]  }
  0x19   :  { %v2216_v55 = vld [vmem:[%s3221_s1 + $0x124] ss:$16 sps:$4 sm:$0xff]   ;;  %v2228_v0 = vld [vmem:[%s3221_s1 + $0x100] ss:$16 sps:$4 sm:$0xff]   ;;  %v2266_v13 = vld [vmem:[%s3221_s1 + $0x2ac] ss:$16 sps:$4 sm:$0xff]  }
  0x1a   :  { %v2226_v61 = vld [vmem:[%s3221_s1 + $0x104] ss:$16 sps:$4 sm:$0xff]   ;;  %v2641_v6 = vld [vmem:[%s3222_s0] ss:$16 sps:$4 sm:$0xff]   ;;  %v2674_v14 = vld [vmem:[%s3222_s0 + $0x68] ss:$16 sps:$4 sm:$0xff]  }
  0x1b   :  { %840 = vmatpush1.bf16.msra.mxu0 %v2171_v22  ;;  %951 = vmatpush1.bf16.msra.mxu1 %v2200_v28  ;;  %v2649_v8 = vld [vmem:[%s3222_s0 + $0x24] ss:$16 sps:$4 sm:$0xff]   ;;  %v2271_v15 = vld [vmem:[%s3221_s1 + $0x28] ss:$16 sps:$4 sm:$0xff]   ;;  %v2281_v16 = vld [vmem:[%s3221_s1 + $0xc] ss:$16 sps:$4 sm:$0xff]  }
  0x1c   :  { %841 = vmatprep.subr.bf16.mxu0 %v2174_v23  ;;  %952 = vmatprep.subr.bf16.mxu1 %v2202_v29  ;;  %v2685_v17 = vld [vmem:[%s3222_s0 + $0x8c] ss:$16 sps:$4 sm:$0xff]   ;;  %v2690_v18 = vld [vmem:[%s3222_s0 + $0x20] ss:$16 sps:$4 sm:$0xff]   ;;  %v2695_v19 = vld [vmem:[%s3222_s0 + $0x44] ss:$16 sps:$4 sm:$0xff]  }
  0x1d   :  { %v2264_v20 = vld [vmem:[%s3221_s1 + $0x2a8] ss:$16 sps:$4 sm:$0xff]   ;;  %v2276_v21 = vld [vmem:[%s3221_s1 + $0x28c] ss:$16 sps:$4 sm:$0xff]  }
  0x1e   :  { %v2279_v22 = vld [vmem:[%s3221_s1 + $0x8] ss:$16 sps:$4 sm:$0xff]   ;;  %v2288_v23 = vld [vmem:[%s3221_s1 + $0x1ec] ss:$16 sps:$4 sm:$0xff]  }
  0x1f   :  { %842 = vmatpush1.bf16.msra.mxu0 %v2177_v26  ;;  %953 = vmatpush1.bf16.msra.mxu1 %v2206_v32  ;;  %v2274_v24 = vld [vmem:[%s3221_s1 + $0x288] ss:$16 sps:$4 sm:$0xff]   ;;  %v2296_v28 = vld [vmem:[%s3221_s1 + $0x1cc] ss:$16 sps:$4 sm:$0xff]  }
  0x20   :  { %843 = vmatprep.subr.bf16.mxu0 %v2180_v27  ;;  %954 = vmatprep.subr.bf16.mxu1 %v2208_v33  ;;  %v2719_v25 = vld [vmem:[%s3222_s0 + $0x88] ss:$16 sps:$4 sm:$0xff]   ;;  %v2291_v27 = vld [vmem:[%s3221_s1 + $0x26c] ss:$16 sps:$4 sm:$0xff]  }
  0x21   :  { %v2286_v26 = vld [vmem:[%s3221_s1 + $0x1e8] ss:$16 sps:$4 sm:$0xff]   ;;  %v2734_v29 = vld [vmem:[%s3222_s0 + $0xac] ss:$16 sps:$4 sm:$0xff]  }
  0x22   :  { %v2289_v32 = vld [vmem:[%s3221_s1 + $0x268] ss:$16 sps:$4 sm:$0xff]  }
  0x23   :  { %844 = vmatpush2.bf16.msra.mxu0 %v2183_v30  ;;  %955 = vmatpush1.bf16.msra.mxu1 %v2212_v37  ;;  %v2739_v30 = vld [vmem:[%s3222_s0 + $0x40] ss:$16 sps:$4 sm:$0xff]   ;;  %v2294_v33 = vld [vmem:[%s3221_s1 + $0x1c8] ss:$16 sps:$4 sm:$0xff]  }
  0x24   :  { %845 = vmatprep.subr.bf16.mxu0 %v2186_v31  ;;  %970 = vmatprep.subr.bf16.mxu1 %v2214_v38  ;;  %v2744_v31 = vld [vmem:[%s3222_s0 + $0x64] ss:$16 sps:$4 sm:$0xff]   ;;  %v2765_v37 = vld [vmem:[%s3222_s0 + $0xa8] ss:$16 sps:$4 sm:$0xff]  }
  0x25   :  { %v2301_v38 = vld [vmem:[%s3221_s1 + $0x1a8] ss:$16 sps:$4 sm:$0xff]  }
  0x27   :  { %846 = vmatpush2.bf16.msra.mxu0 %v2189_v35  ;;  %971 = vmatpush2.bf16.msra.mxu1 %v2218_v42  ;;  %v2306_v35 = vld [vmem:[%s3221_s1 + $0x24c] ss:$16 sps:$4 sm:$0xff]  }
  0x28   :  { %847 = vmatprep.subr.bf16.mxu0 %v2192_v36  ;;  %1053 = vmatprep.subr.bf16.mxu1 %v2225_v43  ;;  %v2303_v36 = vld [vmem:[%s3221_s1 + $0x1ac] ss:$16 sps:$4 sm:$0xff]  }
  0x29   :  { %v2780_v42 = vld [vmem:[%s3222_s0 + $0xcc] ss:$16 sps:$4 sm:$0xff]  }
  0x2a   :  { %973 = vmatmul.mubr.bf16.vlgmr.msra.gmra.mxu1 %v2551_v46  ;;  %v2321_v43 = vld [vmem:[%s3221_s1 + $0x22c] ss:$16 sps:$4 sm:$0xff]  }
  0x2b   :  { %848 = vmatpush2.bf16.msra.mxu0 %v2195_v40  ;;  %1054 = vmatpush1.bf16.msra.mxu1 %v2223_v47  ;;  %v2304_v40 = vld [vmem:[%s3221_s1 + $0x248] ss:$16 sps:$4 sm:$0xff]  }
  0x2c   :  { %849 = vmatprep.subr.bf16.mxu0 %v2198_v41  ;;  %1055 = vmatprep.subr.bf16.mxu1 %v2234_v48  ;;  %v2311_v41 = vld [vmem:[%s3221_s1 + $0x18c] ss:$16 sps:$4 sm:$0xff]   ;;  %v2319_v47 = vld [vmem:[%s3221_s1 + $0x228] ss:$16 sps:$4 sm:$0xff]  }
  0x2d   :  { %1978 = vmatprep.mubr.msk.bf16.mxu1 %vm802_vm0, %v2562_v49  ;;  %v2309_v48 = vld [vmem:[%s3221_s1 + $0x188] ss:$16 sps:$4 sm:$0xff]  }
  0x2f   :  { %850 = vmatpush2.bf16.msra.mxu0 %v2201_v44  ;;  %1056 = vmatpush1.bf16.msra.mxu1 %v2232_v52  ;;  %v2788_v44 = vld [vmem:[%s3222_s0 + $0x60] ss:$16 sps:$4 sm:$0xff]   ;;  %v2815_v52 = vld [vmem:[%s3222_s0 + $0xc8] ss:$16 sps:$4 sm:$0xff]  }
  0x30   :  { %851 = vmatprep.subr.bf16.mxu0 %v2204_v45  ;;  %1057 = vmatprep.subr.bf16.mxu1 %v2243_v53  ;;  %v2793_v45 = vld [vmem:[%s3222_s0 + $0x84] ss:$16 sps:$4 sm:$0xff]   ;;  %v2330_v53 = vld [vmem:[%s3221_s1 + $0x208] ss:$16 sps:$4 sm:$0xff]  }
  0x32   :  { %983 = vmatmul.mubr.bf16.gmra.mxu1 %v2588_v56 }
  0x33   :  { %852 = vmatpush2.bf16.msra.mxu0 %v2207_v50  ;;  %1058 = vmatpush1.bf16.msra.mxu1 %v2241_v57  ;;  %v2332_v50 = vld [vmem:[%s3221_s1 + $0x20c] ss:$16 sps:$4 sm:$0xff]  }
  0x34   :  { %853 = vmatprep.subr.bf16.mxu0 %v2210_v51  ;;  %1059 = vmatprep.subr.bf16.mxu1 %v2248_v58  ;;  %v2318_v51 = vld [vmem:[%s3221_s1 + $0x16c] ss:$16 sps:$4 sm:$0xff]  }
  0x35   :  { %1979 = vmatprep.mubr.msk.bf16.mxu1 %vm802_vm0, %v2599_v59  ;;  %v2326_v57 = vld [vmem:[%s3221_s1 + $0x14c] ss:$16 sps:$4 sm:$0xff]  }
  0x36   :  { %v2345_v58 = vld [vmem:[%s3221_s1 + $0x30c] ss:$16 sps:$4 sm:$0xff]  }
  0x37   :  { %854 = vmatpush2.bf16.msra.mxu0 %v2213_v54  ;;  %1060 = vmatpush1.bf16.msra.mxu1 %v2246_v62  ;;  %v2316_v54 = vld [vmem:[%s3221_s1 + $0x168] ss:$16 sps:$4 sm:$0xff]  }
  0x38   :  { %855 = vmatprep.subr.bf16.mxu0 %v2216_v55  ;;  %1061 = vmatprep.subr.bf16.mxu1 %v2258_v63  ;;  %v2826_v55 = vld [vmem:[%s3222_s0 + $0xec] ss:$16 sps:$4 sm:$0xff]   ;;  %v2343_v62 = vld [vmem:[%s3221_s1 + $0x308] ss:$16 sps:$4 sm:$0xff]  }
  0x39   :  { %v2324_v63 = vld [vmem:[%s3221_s1 + $0x148] ss:$16 sps:$4 sm:$0xff]  }
  0x3a   :  { %993 = vmatmul.mubr.bf16.gmra.mxu1 %v2625_v2 }
  0x3b   :  { %856 = vmatpush2.bf16.msra.mxu0 %v2219_v60  ;;  %1062 = vmatpush1.bf16.msra.mxu1 %v2256_v3  ;;  %v2297_v60 = vld [vmem:[%s3222_s0 + $0x80] ss:$16 sps:$4 sm:$0xff]   ;;  %v2334_v3 = vld [vmem:[%s3221_s1 + $0x128] ss:$16 sps:$4 sm:$0xff]  }
  0x3c   :  { %857 = vmatprep.subr.bf16.mxu0 %v2226_v61  ;;  %1063 = vmatprep.subr.bf16.mxu1 %v2263_v4  ;;  %v2307_v61 = vld [vmem:[%s3222_s0 + $0xa4] ss:$16 sps:$4 sm:$0xff]   ;;  %v2341_v4 = vld [vmem:[%s3221_s1 + $0x10c] ss:$16 sps:$4 sm:$0xff]  }
  0x3d   :  { %1980 = vmatprep.mubr.msk.bf16.mxu1 %vm802_vm0, %v2636_v5 }
  0x3f   :  { %858 = vmatpush2.bf16.msra.mxu0 %v2228_v0  ;;  %1064 = vmatpush1.bf16.msra.mxu1 %v2261_v10  ;;  %v2336_v0 = vld [vmem:[%s3221_s1 + $0x12c] ss:$16 sps:$4 sm:$0xff]   ;;  %v2339_v10 = vld [vmem:[%s3221_s1 + $0x108] ss:$16 sps:$4 sm:$0xff]  }
  0x40   :  { %1166 = vmatprep.subr.bf16.mxu0 %v2237_v1  ;;  %1065 = vmatprep.subr.bf16.mxu1 %v2273_v11  ;;  %v2855_v1 = vld [vmem:[%s3222_s0 + $0xe8] ss:$16 sps:$4 sm:$0xff]   ;;  %v2327_v11 = vld [vmem:[%s3222_s0 + $0xc0] ss:$16 sps:$4 sm:$0xff]  }
  0x42   :  { %860 = vmatmul.mubr.bf16.vlgmr.msra.gmra.mxu0 %v2641_v6  ;;  %1003 = vmatmul.mubr.bf16.gmra.mxu1 %v2674_v14 }
  0x43   :  { %1167 = vmatpush1.bf16.msra.mxu0 %v2235_v7  ;;  %869 = vmatprep.mubr.bf16.mxu0 %v2649_v8  ;;  %v2312_v7 = vld [vmem:[%s3222_s0 + $0xa0] ss:$16 sps:$4 sm:$0xff]  }
  0x44   :  { %1168 = vmatprep.subr.bf16.mxu0 %v2252_v9  ;;  %1066 = vmatpush1.bf16.msra.mxu1 %v2271_v15  ;;  %v2322_v9 = vld [vmem:[%s3222_s0 + $0xc4] ss:$16 sps:$4 sm:$0xff]  }
  0x45   :  { %1067 = vmatprep.subr.bf16.mxu1 %v2281_v16  ;;  %1981 = vmatprep.mubr.msk.bf16.mxu1 %vm802_vm0, %v2685_v17  ;;  %v1385_v15 = vld [vmem:[%s3223_s2 + $0x50] sm:$0xff]  ;;  %v1400_v16 = vld [vmem:[%s3223_s2 + $0xc8] sm:$0xff] }
  0x47   :  { %1169 = vmatpush1.bf16.msra.mxu0 %v2250_v12  ;;  %v2337_v12 = vld [vmem:[%s3222_s0 + $0xe4] ss:$16 sps:$4 sm:$0xff]  }
  0x48   :  { %1170 = vmatprep.subr.bf16.mxu0 %v2266_v13  ;;  %1068 = vmatpush1.bf16.msra.mxu1 %v2279_v22  ;;  %v1386_v13 = vld [vmem:[%s3223_s2 + $0x58] sm:$0xff]  ;;  %v1397_v22 = vld [vmem:[%s3223_s2 + $0xb0] sm:$0xff] }
  0x49   :  { %1069 = vmatprep.subr.bf16.mxu1 %v2288_v23  ;;  %v1381_v23 = vld [vmem:[%s3223_s2 + $0x30] sm:$0xff] }
  0x4a   :  { %870 = vmatmul.mubr.bf16.gmra.mxu0 %v2690_v18  ;;  %1013 = vmatmul.mubr.bf16.gmra.mxu1 %v2719_v25 }
  0x4b   :  { %879 = vmatprep.mubr.bf16.mxu0 %v2695_v19  ;;  %1171 = vmatpush1.bf16.msra.mxu0 %v2264_v20  ;;  %v1398_v20 = vld [vmem:[%s3223_s2 + $0xb8] sm:$0xff] }
  0x4c   :  { %1172 = vmatprep.subr.bf16.mxu0 %v2276_v21  ;;  %1070 = vmatpush2.bf16.msra.mxu1 %v2286_v26  ;;  %v1382_v21 = vld [vmem:[%s3223_s2 + $0x38] sm:$0xff]  ;;  %v1395_v26 = vld [vmem:[%s3223_s2 + $0xa0] sm:$0xff] }
  0x4d   :  { %1071 = vmatprep.subr.bf16.mxu1 %v2296_v28  ;;  %1982 = vmatprep.mubr.msk.bf16.mxu1 %vm802_vm0, %v2734_v29  ;;  %v1394_v28 = vld [vmem:[%s3223_s2 + $0x98] sm:$0xff] }
  0x4f   :  { %1173 = vmatpush1.bf16.msra.mxu0 %v2274_v24  ;;  %v1396_v24 = vld [vmem:[%s3223_s2 + $0xa8] sm:$0xff] }
  0x50   :  { %1174 = vmatprep.subr.bf16.mxu0 %v2291_v27  ;;  %1072 = vmatpush2.bf16.msra.mxu1 %v2294_v33  ;;  %v1379_v27 = vld [vmem:[%s3223_s2 + $0x20] sm:$0xff]  ;;  %v1376_v33 = vld [vmem:[%s3223_s2 + $0x8] sm:$0xff] }
  0x51   :  { %1073 = vmatprep.subr.bf16.mxu1 %v2303_v36  ;;  %v1375_v36 = vld [vmem:[%s3223_s2] sm:$0xff] }
  0x52   :  { %880 = vmatmul.mubr.bf16.gmra.mxu0 %v2739_v30  ;;  %1023 = vmatmul.mubr.bf16.gmra.mxu1 %v2765_v37 }
  0x53   :  { %889 = vmatprep.mubr.bf16.mxu0 %v2744_v31  ;;  %1175 = vmatpush1.bf16.msra.mxu0 %v2289_v32  ;;  %v1392_v32 = vld [vmem:[%s3223_s2 + $0x88] sm:$0xff] }
  0x54   :  { %1176 = vmatprep.subr.bf16.mxu0 %v2306_v35  ;;  %1074 = vmatpush2.bf16.msra.mxu1 %v2301_v38  ;;  %v1391_v35 = vld [vmem:[%s3223_s2 + $0x80] sm:$0xff] }
  0x55   :  { %1983 = vmatprep.mubr.msk.bf16.mxu1 %vm802_vm0, %v2780_v42  ;;  %1075 = vmatprep.subr.bf16.mxu1 %v2311_v41 }
  0x57   :  { %1177 = vmatpush1.bf16.msra.mxu0 %v2304_v40 }
  0x58   :  { %1178 = vmatprep.subr.bf16.mxu0 %v2321_v43  ;;  %1076 = vmatpush2.bf16.msra.mxu1 %v2309_v48 }
  0x59   :  { %1077 = vmatprep.subr.bf16.mxu1 %v2318_v51 }
  0x5a   :  { %890 = vmatmul.mubr.bf16.gmra.mxu0 %v2788_v44  ;;  %1033 = vmatmul.mubr.bf16.gmra.mxu1 %v2815_v52 }
  0x5b   :  { %899 = vmatprep.mubr.bf16.mxu0 %v2793_v45  ;;  %1179 = vmatpush1.bf16.msra.mxu0 %v2319_v47 }
  0x5c   :  { %1180 = vmatprep.subr.bf16.mxu0 %v2332_v50  ;;  %1078 = vmatpush2.bf16.msra.mxu1 %v2316_v54 }
  0x5d   :  { %1984 = vmatprep.mubr.msk.bf16.mxu1 %vm802_vm0, %v2826_v55  ;;  %1079 = vmatprep.subr.bf16.mxu1 %v2326_v57 }
  0x5f   :  { %1181 = vmatpush1.bf16.msra.mxu0 %v2330_v53 }
  0x60   :  { %1196 = vmatprep.subr.bf16.mxu0 %v2345_v58  ;;  %1080 = vmatpush2.bf16.msra.mxu1 %v2324_v63 }
  0x61   :  { %1081 = vmatprep.subr.bf16.mxu1 %v2336_v0  ;;  %v1605_v0 = vld [vmem:[%s3224_s3 + $0x28] sm:$0x1] }
  0x62   :  { %900 = vmatmul.mubr.bf16.gmra.mxu0 %v2297_v60  ;;  %1043 = vmatmul.mubr.bf16.gmra.mxu1 %v2855_v1 }
  0x63   :  { %909 = vmatprep.mubr.bf16.mxu0 %v2307_v61  ;;  %1197 = vmatpush2.bf16.msra.mxu0 %v2343_v62 }
  0x64   :  { %1082 = vmatpush2.bf16.msra.mxu1 %v2334_v3  ;;  %1085 = vmatprep.mubr.bf16.mxu1 %v2527_v39  ;;  %v2342_v39 = vld [vmem:[%s3222_s0 + $0xe0] ss:$16 sps:$4 sm:$0xff]  }
  0x65   :  { %1083 = vmatprep.subr.bf16.mxu1 %v2341_v4  ;;  %2112 = vmatprep.subr.msk.mxu0 %vm1655_vm1, %v1605_v0 }
  0x68   :  { %1084 = vmatpush2.bf16.msra.mxu1 %v2339_v10 }
  0x6a   :  { %910 = vmatmul.mubr.bf16.gmra.mxu0 %v2312_v7 }
  0x6b   :  { %919 = vmatprep.mubr.bf16.mxu0 %v2322_v9  ;;  %1086 = vmatmul.mubr.bf16.vlgmr.msra.gmra.mxu1 %v2641_v6  ;;  %v1387_v6 = vld [vmem:[%s3223_s2 + $0x60] sm:$0xff] }
  0x6c   :  { %1095 = vmatprep.mubr.bf16.mxu1 %v2649_v8  ;;  %v1402_v8 = vld [vmem:[%s3223_s2 + $0xd8] sm:$0xff] }
  0x72   :  { %920 = vmatmul.mubr.bf16.gmra.mxu0 %v2327_v11 }
  0x73   :  { %929 = vmatprep.mubr.bf16.mxu0 %v2337_v12  ;;  %1096 = vmatmul.mubr.bf16.gmra.mxu1 %v2690_v18  ;;  %v1399_v18 = vld [vmem:[%s3223_s2 + $0xc0] sm:$0xff] }
  0x74   :  { %1105 = vmatprep.mubr.bf16.mxu1 %v2695_v19  ;;  %v1383_v19 = vld [vmem:[%s3223_s2 + $0x40] sm:$0xff] }
  0x7a   :  { %930 = vmatmul.mubr.bf16.gmra.mxu0 %v2342_v39 }
  0x7b   :  { %1985 = vmatprep.mubr.msk.bf16.mxu0 %vm802_vm0, %v2508_v34  ;;  %1106 = vmatmul.mubr.bf16.gmra.mxu1 %v2739_v30  ;;  %v1406_v34 = vld [vmem:[%s3223_s2 + $0xf8] sm:$0xff]  ;;  %v1393_v30 = vld [vmem:[%s3223_s2 + $0x90] sm:$0xff] }
  0x7c   :  { %1115 = vmatprep.mubr.bf16.mxu1 %v2744_v31  ;;  %2010 = vmatprep.subr.mxu1 %v1406_v34  ;;  %v1377_v31 = vld [vmem:[%s3223_s2 + $0x10] sm:$0xff] }
  0x82   :  { %1199 = vmatmul.mubr.bf16.vlgmr.msra.gmra.mxu0 %v2551_v46  ;;  %v1390_v46 = vld [vmem:[%s3223_s2 + $0x78] sm:$0xff] }
  0x83   :  { %1986 = vmatprep.mubr.msk.bf16.mxu0 %vm802_vm0, %v2562_v49  ;;  %1116 = vmatmul.mubr.bf16.gmra.mxu1 %v2788_v44  ;;  %v1405_v49 = vld [vmem:[%s3223_s2 + $0xf0] sm:$0xff] }
  0x84   :  { %1125 = vmatprep.mubr.bf16.mxu1 %v2793_v45  ;;  %2011 = vmatpush3.msra.mxu1 %v1390_v46 }
  0x85   :  { %2012 = vmatprep.subr.mxu1 %v1405_v49  ;;  %2113 = vmatpush3.msk.msra.mxu0 %vm1655_vm1, %v1605_v0 }
  0x8a   :  { %1209 = vmatmul.mubr.bf16.gmra.mxu0 %v2588_v56  ;;  %v1389_v56 = vld [vmem:[%s3223_s2 + $0x70] sm:$0xff] }
  0x8b   :  { %1987 = vmatprep.mubr.msk.bf16.mxu0 %vm802_vm0, %v2599_v59  ;;  %1126 = vmatmul.mubr.bf16.gmra.mxu1 %v2297_v60  ;;  %v1404_v59 = vld [vmem:[%s3223_s2 + $0xe8] sm:$0xff] }
  0x8c   :  { %1135 = vmatprep.mubr.bf16.mxu1 %v2307_v61  ;;  %2013 = vmatpush3.msra.mxu1 %v1389_v56 }
  0x8d   :  { %2014 = vmatprep.subr.mxu1 %v1404_v59 }
  0x92   :  { %1219 = vmatmul.mubr.bf16.gmra.mxu0 %v2625_v2  ;;  %v1388_v2 = vld [vmem:[%s3223_s2 + $0x68] sm:$0xff] }
  0x93   :  { %1988 = vmatprep.mubr.msk.bf16.mxu0 %vm802_vm0, %v2636_v5  ;;  %1136 = vmatmul.mubr.bf16.gmra.mxu1 %v2312_v7  ;;  %v1403_v5 = vld [vmem:[%s3223_s2 + $0xe0] sm:$0xff] }
  0x94   :  { %1145 = vmatprep.mubr.bf16.mxu1 %v2322_v9  ;;  %2015 = vmatpush3.msra.mxu1 %v1388_v2  ;;  %v1603_v9 = vld [vmem:[%s3224_s3 + $0x18] sm:$0xff] }
  0x95   :  { %2016 = vmatprep.subr.mxu1 %v1403_v5 }
  0x96   :  { %2017 = vmatpush3.msra.mxu1 %v1387_v6 }
  0x97   :  { %2018 = vmatprep.subr.mxu1 %v1402_v8 }
  0x98   :  { %2019 = vmatpush3.msra.mxu1 %v1386_v13 }
  0x9a   :  { %1229 = vmatmul.mubr.bf16.gmra.mxu0 %v2674_v14  ;;  %v1401_v14 = vld [vmem:[%s3223_s2 + $0xd0] sm:$0xff] }
  0x9b   :  { %1989 = vmatprep.mubr.msk.bf16.mxu0 %vm802_vm0, %v2685_v17  ;;  %1146 = vmatmul.mubr.bf16.gmra.mxu1 %v2327_v11  ;;  %v1384_v17 = vld [vmem:[%s3223_s2 + $0x48] sm:$0xff] }
  0x9c   :  { %1155 = vmatprep.mubr.bf16.mxu1 %v2337_v12  ;;  %2020 = vmatprep.subr.mxu1 %v1401_v14 }
  0x9d   :  { %2021 = vmatpush3.msra.mxu1 %v1385_v15 }
  0x9e   :  { %2022 = vmatprep.subr.mxu1 %v1400_v16 }
  0x9f   :  { %2023 = vmatpush3.msra.mxu1 %v1384_v17 }
  0xa0   :  { %2024 = vmatprep.subr.mxu1 %v1399_v18 }
  0xa1   :  { %2025 = vmatpush3.msra.mxu1 %v1383_v19 }
  0xa2   :  { %1239 = vmatmul.mubr.bf16.gmra.mxu0 %v2719_v25  ;;  %2026 = vmatprep.subr.mxu1 %v1398_v20  ;;  %v1380_v25 = vld [vmem:[%s3223_s2 + $0x28] sm:$0xff] }
  0xa3   :  { %1990 = vmatprep.mubr.msk.bf16.mxu0 %vm802_vm0, %v2734_v29  ;;  %1156 = vmatmul.mubr.bf16.gmra.mxu1 %v2342_v39  ;;  %v1378_v29 = vld [vmem:[%s3223_s2 + $0x18] sm:$0xff]  ;;  %v1602_v39 = vld [vmem:[%s3224_s3 + $0x10] sm:$0xff] }
  0xa4   :  { %2027 = vmatpush3.msra.mxu1 %v1382_v21 }
  0xa5   :  { %2028 = vmatprep.subr.mxu1 %v1397_v22 }
  0xa6   :  { %2029 = vmatpush3.msra.mxu1 %v1381_v23 }
  0xa7   :  { %2030 = vmatprep.subr.mxu1 %v1396_v24 }
  0xa8   :  { %2031 = vmatpush3.msra.mxu1 %v1380_v25 }
  0xa9   :  { %2032 = vmatprep.subr.mxu1 %v1395_v26 }
  0xaa   :  { %1249 = vmatmul.mubr.bf16.gmra.mxu0 %v2765_v37  ;;  %2033 = vmatpush3.msra.mxu1 %v1379_v27 }
  0xab   :  { %1991 = vmatprep.mubr.msk.bf16.mxu0 %vm802_vm0, %v2780_v42  ;;  %2034 = vmatprep.subr.mxu1 %v1394_v28 }
  0xac   :  { %2035 = vmatpush3.msra.mxu1 %v1378_v29 }
  0xad   :  { %2036 = vmatprep.subr.mxu1 %v1393_v30 }
  0xae   :  { %2037 = vmatpush3.msra.mxu1 %v1377_v31 }
  0xaf   :  { %2038 = vmatprep.subr.mxu1 %v1392_v32 }
  0xb0   :  { %2039 = vmatpush3.msra.mxu1 %v1376_v33 }
  0xb1   :  { %2040 = vmatprep.subr.mxu1 %v1391_v35 }
  0xb2   :  { %1259 = vmatmul.mubr.bf16.gmra.mxu0 %v2815_v52  ;;  %2041 = vmatpush3.msra.mxu1 %v1375_v36 }
  0xb3   :  { %1992 = vmatprep.mubr.msk.bf16.mxu0 %vm802_vm0, %v2826_v55 }
  0xba   :  { %1269 = vmatmul.mubr.bf16.gmra.mxu0 %v2855_v1  ;;  %v1604_v1 = vld [vmem:[%s3224_s3 + $0x20] sm:$0xff] }
  0xbb   :  { %2114 = vmatprep.subr.mxu0 %v1604_v1 }
  0xbc   :  { %2115 = vmatpush3.msra.mxu0 %v1604_v1 }
  0xbd   :  { %2116 = vmatprep.subr.mxu0 %v1603_v9 }
  0xbe   :  { %2117 = vmatpush3.msra.mxu0 %v1603_v9 }
  0xbf   :  { %2118 = vmatprep.subr.mxu0 %v1602_v39 }
  0xc0   :  { %2119 = vmatpush3.msra.mxu0 %v1602_v39 }
  0xea   :  { %v974_v37 = vpop.f32.mrf.mxu1 }
  0xec   :  { %v976_v38 = vpop.f32.mrf.mxu1 }
  0xee   :  { %v978_v40 = vpop.f32.mrf.mxu1 }
  0xf0   :  { %v980_v41 = vpop.f32.mrf.mxu1 }
  0xf2   :  { %v984_v42 = vpop.f32.mrf.mxu1 }
  0xf4   :  { %v986_v43 = vpop.f32.mrf.mxu1 }
  0xf6   :  { %v988_v44 = vpop.f32.mrf.mxu1 }
  0xf8   :  { %v990_v45 = vpop.f32.mrf.mxu1 }
  0xfa   :  { %v994_v47 = vpop.f32.mrf.mxu1 }
  0xfc   :  { %v996_v48 = vpop.f32.mrf.mxu1 }
  0xfe   :  { %v998_v52 = vpop.f32.mrf.mxu1 }
 0x100   :  { %v1000_v55 = vpop.f32.mrf.mxu1 }
 0x102   :  { %v861_v50 = vpop.f32.mrf.mxu0  ;;  %v1004_v60 = vpop.f32.mrf.mxu1 }
 0x103   :  { %v3011_v51 = vadd.f32 %v974_v37, %v861_v50 }
 0x104   :  { %v863_v53 = vpop.f32.mrf.mxu0  ;;  %v1006_v63 = vpop.f32.mrf.mxu1 }
 0x105   :  { %v3013_v54 = vadd.f32 %v976_v38, %v863_v53 }
 0x106   :  { %v865_v57 = vpop.f32.mrf.mxu0  ;;  %v1008_v7 = vpop.f32.mrf.mxu1 }
 0x107   :  { %v3015_v58 = vadd.f32 %v978_v40, %v865_v57 }
 0x108   :  { %v867_v61 = vpop.f32.mrf.mxu0  ;;  %v1010_v12 = vpop.f32.mrf.mxu1 }
 0x109   :  { %v3017_v62 = vadd.f32 %v980_v41, %v867_v61 }
 0x10a   :  { %v871_v3 = vpop.f32.mrf.mxu0  ;;  %v1014_v49 = vpop.f32.mrf.mxu1 }
 0x10b   :  { %v3025_v4 = vadd.f32 %v984_v42, %v871_v3 }
 0x10c   :  { %v873_v10 = vpop.f32.mrf.mxu0  ;;  %v1016_v2 = vpop.f32.mrf.mxu1 }
 0x10d   :  { %v3030_v11 = vadd.f32 %v986_v43, %v873_v10 }
 0x10e   :  { %v875_v34 = vpop.f32.mrf.mxu0  ;;  %v1018_v8 = vpop.f32.mrf.mxu1 }
 0x10f   :  { %v3035_v46 = vadd.f32 %v988_v44, %v875_v34 }
 0x110   :  { %v877_v56 = vpop.f32.mrf.mxu0  ;;  %v1020_v15 = vpop.f32.mrf.mxu1 }
 0x111   :  { %v3037_v59 = vadd.f32 %v990_v45, %v877_v56 }
 0x112   :  { %v881_v5 = vpop.f32.mrf.mxu0  ;;  %v1024_v18 = vpop.f32.mrf.mxu1 }
 0x113   :  { %v3039_v6 = vadd.f32 %v994_v47, %v881_v5 }
 0x114   :  { %v883_v13 = vpop.f32.mrf.mxu0  ;;  %v1026_v21 = vpop.f32.mrf.mxu1 }
 0x115   :  { %v3041_v14 = vadd.f32 %v996_v48, %v883_v13 }
 0x116   :  { %v885_v16 = vpop.f32.mrf.mxu0  ;;  %v1028_v24 = vpop.f32.mrf.mxu1 }
 0x117   :  { %v3043_v17 = vadd.f32 %v998_v52, %v885_v16 }
 0x118   :  { %v887_v19 = vpop.f32.mrf.mxu0  ;;  %v1030_v27 = vpop.f32.mrf.mxu1 }
 0x119   :  { %v3045_v20 = vadd.f32 %v1000_v55, %v887_v19 }
 0x11a   :  { %v891_v22 = vpop.f32.mrf.mxu0  ;;  %v1034_v30 = vpop.f32.mrf.mxu1 }
 0x11b   :  { %v3047_v23 = vadd.f32 %v1004_v60, %v891_v22 }
 0x11c   :  { %v893_v25 = vpop.f32.mrf.mxu0  ;;  %v1036_v33 = vpop.f32.mrf.mxu1 }
 0x11d   :  { %v3049_v26 = vadd.f32 %v1006_v63, %v893_v25 }
 0x11e   :  { %v895_v28 = vpop.f32.mrf.mxu0  ;;  %v1038_v37 = vpop.f32.mrf.mxu1 }
 0x11f   :  { %v3051_v29 = vadd.f32 %v1008_v7, %v895_v28 }
 0x120   :  { %v897_v31 = vpop.f32.mrf.mxu0  ;;  %v1040_v41 = vpop.f32.mrf.mxu1 }
 0x121   :  { %v3053_v32 = vadd.f32 %v1010_v12, %v897_v31 }
 0x122   :  { %v901_v35 = vpop.f32.mrf.mxu0  ;;  %v1044_v44 = vpop.f32.mrf.mxu1 }
 0x123   :  { %v3055_v36 = vadd.f32 %v1014_v49, %v901_v35 }
 0x124   :  { %v903_v38 = vpop.f32.mrf.mxu0  ;;  %v1046_v48 = vpop.f32.mrf.mxu1 }
 0x125   :  { %v3057_v40 = vadd.f32 %v1016_v2, %v903_v38 }
 0x126   :  { %v905_v42 = vpop.f32.mrf.mxu0  ;;  %v1048_v53 = vpop.f32.mrf.mxu1 }
 0x127   :  { %v3059_v43 = vadd.f32 %v1018_v8, %v905_v42 }
 0x128   :  { %v907_v45 = vpop.f32.mrf.mxu0  ;;  %v1050_v60 = vpop.f32.mrf.mxu1 }
 0x129   :  { %v3061_v47 = vadd.f32 %v1020_v15, %v907_v45 }
 0x12a   :  { %v911_v50 = vpop.f32.mrf.mxu0 }
 0x12b   :  { %v3063_v52 = vadd.f32 %v1024_v18, %v911_v50  ;;  %v1087_v0 = vpop.f32.mrf.mxu1 }
 0x12c   :  { %v913_v55 = vpop.f32.mrf.mxu0 }
 0x12d   :  { %v3065_v57 = vadd.f32 %v1026_v21, %v913_v55  ;;  %v1089_v7 = vpop.f32.mrf.mxu1 }
 0x12e   :  { %v915_v61 = vpop.f32.mrf.mxu0 }
 0x12f   :  { %v3067_v63 = vadd.f32 %v1028_v24, %v915_v61  ;;  %v1091_v12 = vpop.f32.mrf.mxu1 }
 0x130   :  { %v917_v1 = vpop.f32.mrf.mxu0 }
 0x131   :  { %v3069_v3 = vadd.f32 %v1030_v27, %v917_v1  ;;  %v1093_v49 = vpop.f32.mrf.mxu1 }
 0x132   :  { %v921_v9 = vpop.f32.mrf.mxu0 }
 0x133   :  { %v3071_v10 = vadd.f32 %v1034_v30, %v921_v9  ;;  %v1097_v5 = vpop.f32.mrf.mxu1 }
 0x134   :  { %v923_v39 = vpop.f32.mrf.mxu0 }
 0x135   :  { %v3073_v34 = vadd.f32 %v1036_v33, %v923_v39  ;;  %v1099_v15 = vpop.f32.mrf.mxu1 }
 0x136   :  { %v925_v56 = vpop.f32.mrf.mxu0 }
 0x137   :  { %v3075_v2 = vadd.f32 %v1038_v37, %v925_v56  ;;  %v1101_v19 = vpop.f32.mrf.mxu1 }
 0x138   :  { %v927_v8 = vpop.f32.mrf.mxu0 }
 0x139   :  { %v3077_v13 = vadd.f32 %v1040_v41, %v927_v8  ;;  %v1103_v24 = vpop.f32.mrf.mxu1 }
 0x13a   :  { %v931_v16 = vpop.f32.mrf.mxu0 }
 0x13b   :  { %v3079_v18 = vadd.f32 %v1044_v44, %v931_v16  ;;  %v1107_v28 = vpop.f32.mrf.mxu1  ;;  %v1284_v16 = vmul.f32 %v3017_v62, %v3017_v62  ;;  %v1288_v62 = vmul.f32 %v3030_v11, %v3030_v11  ;;  %v1292_v11 = vmul.f32 %v3037_v59, %v3037_v59 }
 0x13c   :  { %v933_v21 = vpop.f32.mrf.mxu0  ;;  %v1296_v59 = vmul.f32 %v3041_v14, %v3041_v14  ;;  %v1300_v14 = vmul.f32 %v3045_v20, %v3045_v20 }
 0x13d   :  { %v3081_v22 = vadd.f32 %v1046_v48, %v933_v21  ;;  %v1109_v33 = vpop.f32.mrf.mxu1  ;;  %v1280_v48 = vmul.f32 %v3013_v54, %v3013_v54 }
 0x13e   :  { %v935_v25 = vpop.f32.mrf.mxu0 }
 0x13f   :  { %v3083_v27 = vadd.f32 %v1048_v53, %v935_v25  ;;  %v1111_v38 = vpop.f32.mrf.mxu1  ;;  %v1283_v25 = vmul.f32 %v3015_v58, %v3015_v58  ;;  %v1287_v58 = vmul.f32 %v3025_v4, %v3025_v4  ;;  %v1291_v4 = vmul.f32 %v3035_v46, %v3035_v46 }
 0x140   :  { %v937_v30 = vpop.f32.mrf.mxu0  ;;  %v1295_v46 = vmul.f32 %v3039_v6, %v3039_v6  ;;  %v1299_v6 = vmul.f32 %v3043_v17, %v3043_v17 }
 0x141   :  { %v3085_v31 = vadd.f32 %v1050_v60, %v937_v30  ;;  %v3087_v44 = vpop.f32.mrf.mxu1  ;;  %v1279_v60 = vmul.f32 %v3011_v51, %v3011_v51 }
 0x142   :  { %v1200_v35 = vpop.f32.mrf.mxu0 }
 0x143   :  { %v1201_v37 = vadd.f32 %v1200_v35, %v1087_v0  ;;  %v3091_v61 = vpop.f32.mrf.mxu1 }
 0x144   :  { %v1202_v41 = vpop.f32.mrf.mxu0 }
 0x145   :  { %v1203_v42 = vadd.f32 %v1202_v41, %v1089_v7  ;;  %v1281_v45 = vmul.f32 %v1201_v37, %v1201_v37  ;;  %v3095_v39 = vpop.f32.mrf.mxu1 }
 0x146   :  { %v1204_v50 = vpop.f32.mrf.mxu0 }
 0x147   :  { %v1282_v55 = vmul.f32 %v1203_v42, %v1203_v42  ;;  %v1205_v53 = vadd.f32 %v1204_v50, %v1091_v12  ;;  %v1343_v7 = vadd.f32 %v1281_v45, %v1279_v60  ;;  %v3099_v12 = vpop.f32.mrf.mxu1 }
 0x148   :  { %v1206_v1 = vpop.f32.mrf.mxu0 }
 0x149   :  { %v1344_v9 = vadd.f32 %v1282_v55, %v1280_v48  ;;  %v1207_v0 = vadd.f32 %v1206_v1, %v1093_v49  ;;  %v1285_v56 = vmul.f32 %v1205_v53, %v1205_v53  ;;  %v3103_v35 = vpop.f32.mrf.mxu1 }
 0x14a   :  { %v1210_v8 = vpop.f32.mrf.mxu0 }
 0x14b   :  { %v1286_v21 = vmul.f32 %v1207_v0, %v1207_v0  ;;  %v1211_v54 = vadd.f32 %v1210_v8, %v1097_v5  ;;  %1471 = vmatprep.mubr.f32.mxu1 %v1344_v9  ;;  %v1345_v37 = vadd.f32 %v1285_v56, %v1283_v25  ;;  %v3107_v50 = vpop.f32.mrf.mxu1 }
 0x14c   :  { %v1212_v51 = vpop.f32.mrf.mxu0  ;;  %1472 = vmatmul.mubr.f32.vlgmr.msra.gmra.mxu1 %v1343_v7 }
 0x14d   :  { %v1346_v30 = vadd.f32 %v1286_v21, %v1284_v16  ;;  %v1213_v49 = vadd.f32 %v1212_v51, %v1099_v15  ;;  %v1289_v41 = vmul.f32 %v1211_v54, %v1211_v54  ;;  %v3111_v53 = vpop.f32.mrf.mxu1 }
 0x14e   :  { %v1214_v42 = vpop.f32.mrf.mxu0 }
 0x14f   :  { %v1290_v45 = vmul.f32 %v1213_v49, %v1213_v49  ;;  %v1215_v5 = vadd.f32 %v1214_v42, %v1101_v19  ;;  %1476 = vmatprep.mubr.f32.mxu1 %v1346_v30  ;;  %v1347_v60 = vadd.f32 %v1289_v41, %v1287_v58  ;;  %v3115_v7 = vpop.f32.mrf.mxu1 }
 0x150   :  { %v1216_v48 = vpop.f32.mrf.mxu0  ;;  %1477 = vmatmul.mubr.f32.gmra.mxu1 %v1345_v37 }
 0x151   :  { %v1348_v55 = vadd.f32 %v1290_v45, %v1288_v62  ;;  %v1217_v15 = vadd.f32 %v1216_v48, %v1103_v24  ;;  %v1293_v1 = vmul.f32 %v1215_v5, %v1215_v5  ;;  %v3119_v16 = vpop.f32.mrf.mxu1 }
 0x152   :  { %v1220_v9 = vpop.f32.mrf.mxu0 }
 0x153   :  { %v1294_v0 = vmul.f32 %v1217_v15, %v1217_v15  ;;  %v1221_v19 = vadd.f32 %v1220_v9, %v1107_v28  ;;  %1481 = vmatprep.mubr.f32.mxu1 %v1348_v55  ;;  %v1349_v21 = vadd.f32 %v1293_v1, %v1291_v4  ;;  %v3123_v30 = vpop.f32.mrf.mxu1  ;;  %v1304_v9 = vmul.f32 %v3049_v26, %v3049_v26 }
 0x154   :  { %v1222_v56 = vpop.f32.mrf.mxu0  ;;  %1482 = vmatmul.mubr.f32.gmra.mxu1 %v1347_v60 }
 0x155   :  { %v1350_v8 = vadd.f32 %v1294_v0, %v1292_v11  ;;  %v1223_v24 = vadd.f32 %v1222_v56, %v1109_v33  ;;  %v1297_v54 = vmul.f32 %v1221_v19, %v1221_v19  ;;  %v3128_v41 = vpop.f32.mrf.mxu1 }
 0x156   :  { %v1224_v25 = vpop.f32.mrf.mxu0 }
 0x157   :  { %v1298_v51 = vmul.f32 %v1223_v24, %v1223_v24  ;;  %v1225_v28 = vadd.f32 %v1224_v25, %v1111_v38  ;;  %1486 = vmatprep.mubr.f32.mxu1 %v1350_v8  ;;  %v1351_v42 = vadd.f32 %v1297_v54, %v1295_v46  ;;  %v1141_v48 = vpop.f32.mrf.mxu1  ;;  %v1308_v24 = vmul.f32 %v3053_v32, %v3053_v32 }
 0x158   :  { %v1226_v49 = vpop.f32.mrf.mxu0  ;;  %1487 = vmatmul.mubr.f32.gmra.mxu1 %v1349_v21  ;;  %v1312_v46 = vmul.f32 %v3057_v40, %v3057_v40 }
 0x159   :  { %v1352_v37 = vadd.f32 %v1298_v51, %v1296_v59  ;;  %v1227_v33 = vadd.f32 %v1226_v49, %v3087_v44  ;;  %v1301_v62 = vmul.f32 %v1225_v28, %v1225_v28  ;;  %v1143_v0 = vpop.f32.mrf.mxu1 }
 0x15a   :  { %v1230_v45 = vpop.f32.mrf.mxu0 }
 0x15b   :  { %v1302_v38 = vmul.f32 %v1227_v33, %v1227_v33  ;;  %v1231_v5 = vadd.f32 %v1230_v45, %v3091_v61  ;;  %1491 = vmatprep.mubr.f32.mxu1 %v1352_v37  ;;  %v1353_v15 = vadd.f32 %v1301_v62, %v1299_v6  ;;  %v1303_v61 = vmul.f32 %v3047_v23, %v3047_v23  ;;  %v1147_v54 = vpop.f32.mrf.mxu1 }
 0x15c   :  { %v1232_v58 = vpop.f32.mrf.mxu0  ;;  %1492 = vmatmul.mubr.f32.gmra.mxu1 %v1351_v42 }
 0x15d   :  { %v1354_v55 = vadd.f32 %v1302_v38, %v1300_v14  ;;  %v1233_v44 = vadd.f32 %v1232_v58, %v3095_v39  ;;  %v1305_v60 = vmul.f32 %v1231_v5, %v1231_v5  ;;  %v1149_v37 = vpop.f32.mrf.mxu1  ;;  %v1316_v14 = vmul.f32 %v3061_v47, %v3061_v47 }
 0x15e   :  { %v1234_v1 = vpop.f32.mrf.mxu0 }
 0x15f   :  { %v1306_v20 = vmul.f32 %v1233_v44, %v1233_v44  ;;  %v1235_v11 = vadd.f32 %v1234_v1, %v3099_v12  ;;  %1496 = vmatprep.mubr.f32.mxu1 %v1354_v55  ;;  %v1355_v39 = vadd.f32 %v1305_v60, %v1303_v61  ;;  %v1307_v12 = vmul.f32 %v3051_v29, %v3051_v29  ;;  %v1151_v5 = vpop.f32.mrf.mxu1 }
 0x160   :  { %v1236_v17 = vpop.f32.mrf.mxu0  ;;  %1497 = vmatmul.mubr.f32.gmra.mxu1 %v1353_v15  ;;  %v1320_v15 = vmul.f32 %v3065_v57, %v3065_v57  ;;  %v1323_v57 = vmul.f32 %v3067_v63, %v3067_v63 }
 0x161   :  { %v1356_v19 = vadd.f32 %v1306_v20, %v1304_v9  ;;  %v1237_v4 = vadd.f32 %v1236_v17, %v3103_v35  ;;  %v1309_v56 = vmul.f32 %v1235_v11, %v1235_v11  ;;  %v1324_v17 = vmul.f32 %v3069_v3, %v3069_v3 }
 0x162   :  { %v1240_v8 = vpop.f32.mrf.mxu0  ;;  %v1327_v3 = vmul.f32 %v3071_v10, %v3071_v10 }
 0x163   :  { %v1310_v26 = vmul.f32 %v1237_v4, %v1237_v4  ;;  %v1241_v21 = vadd.f32 %v1240_v8, %v3107_v50  ;;  %1501 = vmatprep.mubr.f32.mxu1 %v1356_v19  ;;  %v1357_v35 = vadd.f32 %v1309_v56, %v1307_v12  ;;  %v1311_v50 = vmul.f32 %v3055_v36, %v3055_v36 }
 0x164   :  { %v1242_v23 = vpop.f32.mrf.mxu0  ;;  %1502 = vmatmul.mubr.f32.gmra.mxu1 %v1355_v39 }
 0x165   :  { %v1358_v25 = vadd.f32 %v1310_v26, %v1308_v24  ;;  %v1243_v59 = vadd.f32 %v1242_v23, %v3111_v53  ;;  %v1313_v51 = vmul.f32 %v1241_v21, %v1241_v21  ;;  %v1328_v26 = vmul.f32 %v3073_v34, %v3073_v34 }
 0x166   :  { %v1244_v28 = vpop.f32.mrf.mxu0  ;;  %v1331_v34 = vmul.f32 %v3075_v2, %v3075_v2 }
 0x167   :  { %v1314_v32 = vmul.f32 %v1243_v59, %v1243_v59  ;;  %v1245_v49 = vadd.f32 %v1244_v28, %v3115_v7  ;;  %1506 = vmatprep.mubr.f32.mxu1 %v1358_v25  ;;  %v1359_v53 = vadd.f32 %v1313_v51, %v1311_v50  ;;  %v1315_v7 = vmul.f32 %v3059_v43, %v3059_v43  ;;  %v1153_v43 = vpop.f32.mrf.mxu1 }
 0x168   :  { %v1246_v29 = vpop.f32.mrf.mxu0  ;;  %1507 = vmatmul.mubr.f32.gmra.mxu1 %v1357_v35  ;;  %v1332_v28 = vmul.f32 %v3077_v13, %v3077_v13  ;;  %v1335_v13 = vmul.f32 %v3079_v18, %v3079_v18  ;;  %v1601_v18 = vld [vmem:[%s3224_s3 + $0x8] sm:$0xff] }
 0x169   :  { %v1360_v33 = vadd.f32 %v1314_v32, %v1312_v46  ;;  %v1247_v42 = vadd.f32 %v1246_v29, %v3119_v16  ;;  %v1317_v62 = vmul.f32 %v1245_v49, %v1245_v49  ;;  %2120 = vmatprep.subr.mxu0 %v1601_v18 }
 0x16a   :  { %v1250_v45 = vpop.f32.mrf.mxu0  ;;  %2121 = vmatpush3.msra.mxu0 %v1601_v18 }
 0x16b   :  { %v1318_v40 = vmul.f32 %v1247_v42, %v1247_v42  ;;  %v1251_v38 = vadd.f32 %v1250_v45, %v3123_v30  ;;  %1511 = vmatprep.mubr.f32.mxu1 %v1360_v33  ;;  %v1361_v16 = vadd.f32 %v1317_v62, %v1315_v7  ;;  %v1319_v30 = vmul.f32 %v3063_v52, %v3063_v52  ;;  %v1157_v52 = vpop.f32.mrf.mxu1 }
 0x16c   :  { %v1252_v36 = vpop.f32.mrf.mxu0  ;;  %1512 = vmatmul.mubr.f32.gmra.mxu1 %v1359_v53  ;;  %v1336_v53 = vmul.f32 %v3081_v22, %v3081_v22  ;;  %v1339_v22 = vmul.f32 %v3083_v27, %v3083_v27 }
 0x16d   :  { %v1362_v6 = vadd.f32 %v1318_v40, %v1316_v14  ;;  %v1253_v58 = vadd.f32 %v1252_v36, %v3128_v41  ;;  %v1321_v55 = vmul.f32 %v1251_v38, %v1251_v38  ;;  %v1159_v23 = vpop.f32.mrf.mxu1 }
 0x16e   :  { %v1254_v44 = vpop.f32.mrf.mxu0 }
 0x16f   :  { %v1322_v47 = vmul.f32 %v1253_v58, %v1253_v58  ;;  %v1255_v60 = vadd.f32 %v1254_v44, %v1141_v48  ;;  %1516 = vmatprep.mubr.f32.mxu1 %v1362_v6  ;;  %v1363_v11 = vadd.f32 %v1321_v55, %v1319_v30  ;;  %v1161_v49 = vpop.f32.mrf.mxu1 }
 0x170   :  { %v1256_v1 = vpop.f32.mrf.mxu0  ;;  %1517 = vmatmul.mubr.f32.gmra.mxu1 %v1361_v16 }
 0x171   :  { %v1364_v9 = vadd.f32 %v1322_v47, %v1320_v15  ;;  %v1257_v20 = vadd.f32 %v1256_v1, %v1143_v0  ;;  %v1325_v61 = vmul.f32 %v1255_v60, %v1255_v60  ;;  %v1163_v14 = vpop.f32.mrf.mxu1 }
 0x172   :  { %v1260_v41 = vpop.f32.mrf.mxu0 }
 0x173   :  { %v1326_v19 = vmul.f32 %v1257_v20, %v1257_v20  ;;  %v1261_v4 = vadd.f32 %v1260_v41, %v1147_v54  ;;  %1521 = vmatprep.mubr.f32.mxu1 %v1364_v9  ;;  %v1365_v8 = vadd.f32 %v1325_v61, %v1323_v57 }
 0x174   :  { %v1262_v48 = vpop.f32.mrf.mxu0  ;;  %1522 = vmatmul.mubr.f32.gmra.mxu1 %v1363_v11 }
 0x175   :  { %v1366_v39 = vadd.f32 %v1326_v19, %v1324_v17  ;;  %v1263_v56 = vadd.f32 %v1262_v48, %v1149_v37  ;;  %v1329_v24 = vmul.f32 %v1261_v4, %v1261_v4 }
 0x176   :  { %v1264_v0 = vpop.f32.mrf.mxu0 }
 0x177   :  { %v1330_v21 = vmul.f32 %v1263_v56, %v1263_v56  ;;  %v1265_v12 = vadd.f32 %v1264_v0, %v1151_v5  ;;  %1526 = vmatprep.mubr.f32.mxu1 %v1366_v39  ;;  %v1367_v59 = vadd.f32 %v1329_v24, %v1327_v3  ;;  %v1340_v5 = vmul.f32 %v3085_v31, %v3085_v31  ;;  %v1600_v31 = vld [vmem:[%s3224_s3] sm:$0xff] }
 0x178   :  { %v1266_v54 = vpop.f32.mrf.mxu0  ;;  %1527 = vmatmul.mubr.f32.gmra.mxu1 %v1365_v8  ;;  %2122 = vmatprep.subr.mxu0 %v1600_v31 }
 0x179   :  { %v1368_v63 = vadd.f32 %v1330_v21, %v1328_v26  ;;  %v1267_v25 = vadd.f32 %v1266_v54, %v1153_v43  ;;  %v1333_v35 = vmul.f32 %v1265_v12, %v1265_v12  ;;  %2123 = vmatpush3.msra.mxu0 %v1600_v31 }
 0x17a   :  { %v1270_v51 = vpop.f32.mrf.mxu0 }
 0x17b   :  { %v1334_v46 = vmul.f32 %v1267_v25, %v1267_v25  ;;  %v1271_v32 = vadd.f32 %v1270_v51, %v1157_v52  ;;  %1531 = vmatprep.mubr.f32.mxu1 %v1368_v63  ;;  %v1369_v37 = vadd.f32 %v1333_v35, %v1331_v34 }
 0x17c   :  { %v1272_v50 = vpop.f32.mrf.mxu0  ;;  %1532 = vmatmul.mubr.f32.gmra.mxu1 %v1367_v59 }
 0x17d   :  { %v1370_v10 = vadd.f32 %v1334_v46, %v1332_v28  ;;  %v1273_v29 = vadd.f32 %v1272_v50, %v1159_v23  ;;  %v1337_v33 = vmul.f32 %v1271_v32, %v1271_v32 }
 0x17e   :  { %v1274_v42 = vpop.f32.mrf.mxu0 }
 0x17f   :  { %v1338_v62 = vmul.f32 %v1273_v29, %v1273_v29  ;;  %v1275_v45 = vadd.f32 %v1274_v42, %v1161_v49  ;;  %1536 = vmatprep.mubr.f32.mxu1 %v1370_v10  ;;  %v1371_v7 = vadd.f32 %v1337_v33, %v1335_v13 }
 0x180   :  { %v1276_v40 = vpop.f32.mrf.mxu0  ;;  %1537 = vmatmul.mubr.f32.gmra.mxu1 %v1369_v37 }
 0x181   :  { %v1372_v2 = vadd.f32 %v1338_v62, %v1336_v53  ;;  %v1277_v38 = vadd.f32 %v1276_v40, %v1163_v14  ;;  %v1341_v36 = vmul.f32 %v1275_v45, %v1275_v45 }
 0x183   :  { %v1342_v6 = vmul.f32 %v1277_v38, %v1277_v38  ;;  %1541 = vmatprep.mubr.f32.mxu1 %v1372_v2  ;;  %v1373_v16 = vadd.f32 %v1341_v36, %v1339_v22 }
 0x184   :  { %1542 = vmatmul.mubr.f32.gmra.mxu1 %v1371_v7 }
 0x185   :  { %v1374_v58 = vadd.f32 %v1342_v6, %v1340_v5 }
 0x187   :  { %1546 = vmatprep.mubr.f32.mxu1 %v1374_v58 }
 0x188   :  { %1547 = vmatmul.mubr.f32.gmra.mxu1 %v1373_v16 }
 0x20c   :  { %v2042_v55 = vpop.f32.mrf.mxu1 }
 0x20e   :  { %v2043_v44 = vpop.f32.mrf.mxu1 }
 0x20f   :  { %v2044_v27 = vadd.f32 %v2043_v44, %v2042_v55 }
 0x210   :  { %v2045_v15 = vpop.f32.mrf.mxu1 }
 0x211   :  { %v1552_v47 = vmax.f32 %v2044_v27, 2.220446e-16 }
 0x212   :  { %v2046_v60 = vpop.f32.mrf.mxu1 }
 0x213   :  { %2346 = vlog2.f32 %v1552_v47  ;;  %v2047_v30 = vadd.f32 %v2046_v60, %v2045_v15 }
 0x214   :  { %v2048_v1 = vpop.f32.mrf.mxu1 }
 0x215   :  { %v1553_v43 = vmax.f32 %v2047_v30, 2.220446e-16 }
 0x216   :  { %v2049_v9 = vpop.f32.mrf.mxu1 }
 0x217   :  { %2348 = vlog2.f32 %v1553_v43  ;;  %v2050_v20 = vadd.f32 %v2049_v9, %v2048_v1 }
 0x218   :  { %v2051_v11 = vpop.f32.mrf.mxu1 }
 0x219   :  { %v1554_v61 = vmax.f32 %v2050_v20, 2.220446e-16 }
 0x21a   :  { %v2052_v41 = vpop.f32.mrf.mxu1 }
 0x21b   :  { %2350 = vlog2.f32 %v1554_v61  ;;  %v2053_v17 = vadd.f32 %v2052_v41, %v2051_v11 }
 0x21c   :  { %v2054_v19 = vpop.f32.mrf.mxu1 }
 0x21d   :  { %v1555_v4 = vmax.f32 %v2053_v17, 2.220446e-16 }
 0x21e   :  { %v2055_v57 = vpop.f32.mrf.mxu1 }
 0x21f   :  { %2352 = vlog2.f32 %v1555_v4  ;;  %v2056_v48 = vadd.f32 %v2055_v57, %v2054_v19 }
 0x220   :  { %v2347_v52 = vpop.eup %2346  ;;  %v2057_v39 = vpop.f32.mrf.mxu1 }
 0x221   :  { %v1569_v56 = vmul.f32 0.6931472, %v2347_v52  ;;  %v1556_v8 = vmax.f32 %v2056_v48, 2.220446e-16 }
 0x222   :  { %v2058_v24 = vpop.f32.mrf.mxu1 }
 0x223   :  { %2354 = vlog2.f32 %v1556_v8  ;;  %v2059_v0 = vadd.f32 %v2058_v24, %v2057_v39  ;;  %2124 = vmatprep.mubr.msk.f32.mxu0 %vm1606_vm2, %v1569_v56 }
 0x224   :  { %v2349_v26 = vpop.eup %2348  ;;  %v2060_v21 = vpop.f32.mrf.mxu1 }
 0x225   :  { %v1571_v12 = vmul.f32 0.6931472, %v2349_v26  ;;  %v1557_v3 = vmax.f32 %v2059_v0, 2.220446e-16 }
 0x226   :  { %v2061_v23 = vpop.f32.mrf.mxu1 }
 0x227   :  { %2356 = vlog2.f32 %v1557_v3  ;;  %v2062_v54 = vadd.f32 %v2061_v23, %v2060_v21  ;;  %2125 = vmatmul.mubr.msk.f32.vlgmr.msra.gmra.mxu0 %vm1606_vm2, %v1571_v12 }
 0x228   :  { %v2351_v63 = vpop.eup %2350  ;;  %v2063_v25 = vpop.f32.mrf.mxu1 }
 0x229   :  { %v1573_v59 = vmul.f32 0.6931472, %v2351_v63  ;;  %v1558_v35 = vmax.f32 %v2062_v54, 2.220446e-16 }
 0x22a   :  { %v2064_v51 = vpop.f32.mrf.mxu1 }
 0x22b   :  { %2358 = vlog2.f32 %v1558_v35  ;;  %v2065_v28 = vadd.f32 %v2064_v51, %v2063_v25  ;;  %2127 = vmatprep.mubr.msk.f32.mxu0 %vm1606_vm2, %v1573_v59 }
 0x22c   :  { %v2353_v46 = vpop.eup %2352  ;;  %v2066_v32 = vpop.f32.mrf.mxu1 }
 0x22d   :  { %v1575_v34 = vmul.f32 0.6931472, %v2353_v46  ;;  %v1559_v49 = vmax.f32 %v2065_v28, 2.220446e-16 }
 0x22e   :  { %v2067_v50 = vpop.f32.mrf.mxu1 }
 0x22f   :  { %2360 = vlog2.f32 %v1559_v49  ;;  %v2068_v10 = vadd.f32 %v2067_v50, %v2066_v32  ;;  %2128 = vmatmul.mubr.msk.f32.gmra.mxu0 %vm1606_vm2, %v1575_v34 }
 0x230   :  { %v2355_v29 = vpop.eup %2354  ;;  %v2069_v37 = vpop.f32.mrf.mxu1 }
 0x231   :  { %v1577_v33 = vmul.f32 0.6931472, %v2355_v29  ;;  %v1560_v42 = vmax.f32 %v2068_v10, 2.220446e-16 }
 0x232   :  { %v2070_v53 = vpop.f32.mrf.mxu1 }
 0x233   :  { %2362 = vlog2.f32 %v1560_v42  ;;  %v2071_v62 = vadd.f32 %v2070_v53, %v2069_v37  ;;  %2130 = vmatprep.mubr.msk.f32.mxu0 %vm1606_vm2, %v1577_v33 }
 0x234   :  { %v2357_v45 = vpop.eup %2356  ;;  %v2072_v13 = vpop.f32.mrf.mxu1 }
 0x235   :  { %v1579_v14 = vmul.f32 0.6931472, %v2357_v45  ;;  %v1561_v40 = vmax.f32 %v2071_v62, 2.220446e-16 }
 0x236   :  { %v2073_v2 = vpop.f32.mrf.mxu1 }
 0x237   :  { %2364 = vlog2.f32 %v1561_v40  ;;  %v2074_v38 = vadd.f32 %v2073_v2, %v2072_v13  ;;  %2131 = vmatmul.mubr.msk.f32.gmra.mxu0 %vm1606_vm2, %v1579_v14 }
 0x238   :  { %v2359_v7 = vpop.eup %2358  ;;  %v2075_v36 = vpop.f32.mrf.mxu1 }
 0x239   :  { %v1581_v5 = vmul.f32 0.6931472, %v2359_v7  ;;  %v1562_v6 = vmax.f32 %v2074_v38, 2.220446e-16 }
 0x23a   :  { %v2076_v22 = vpop.f32.mrf.mxu1 }
 0x23b   :  { %2366 = vlog2.f32 %v1562_v6  ;;  %v2077_v58 = vadd.f32 %v2076_v22, %v2075_v36  ;;  %2133 = vmatprep.mubr.msk.f32.mxu0 %vm1606_vm2, %v1581_v5 }
 0x23c   :  { %v2361_v16 = vpop.eup %2360  ;;  %v2078_v18 = vpop.f32.mrf.mxu1 }
 0x23d   :  { %v1583_v31 = vmul.f32 0.6931472, %v2361_v16  ;;  %v1563_v55 = vmax.f32 %v2077_v58, 2.220446e-16 }
 0x23e   :  { %v2079_v44 = vpop.f32.mrf.mxu1 }
 0x23f   :  { %2368 = vlog2.f32 %v1563_v55  ;;  %v2080_v27 = vadd.f32 %v2079_v44, %v2078_v18  ;;  %2134 = vmatmul.mubr.msk.f32.gmra.mxu0 %vm1606_vm2, %v1583_v31 }
 0x240   :  { %v2363_v15 = vpop.eup %2362  ;;  %v2081_v47 = vpop.f32.mrf.mxu1 }
 0x241   :  { %v1585_v60 = vmul.f32 0.6931472, %v2363_v15  ;;  %v1564_v30 = vmax.f32 %v2080_v27, 2.220446e-16 }
 0x242   :  { %v2082_v1 = vpop.f32.mrf.mxu1 }
 0x243   :  { %2370 = vlog2.f32 %v1564_v30  ;;  %v2083_v43 = vadd.f32 %v2082_v1, %v2081_v47  ;;  %2136 = vmatprep.mubr.msk.f32.mxu0 %vm1606_vm2, %v1585_v60 }
 0x244   :  { %v2365_v9 = vpop.eup %2364  ;;  %v2084_v20 = vpop.f32.mrf.mxu1 }
 0x245   :  { %v1587_v11 = vmul.f32 0.6931472, %v2365_v9  ;;  %v1565_v61 = vmax.f32 %v2083_v43, 2.220446e-16 }
 0x246   :  { %v2085_v41 = vpop.f32.mrf.mxu1 }
 0x247   :  { %2372 = vlog2.f32 %v1565_v61  ;;  %v2086_v17 = vadd.f32 %v2085_v41, %v2084_v20  ;;  %2137 = vmatmul.mubr.msk.f32.gmra.mxu0 %vm1606_vm2, %v1587_v11 }
 0x248   :  { %v2367_v19 = vpop.eup %2366  ;;  %v2087_v4 = vpop.f32.mrf.mxu1 }
 0x249   :  { %v1589_v57 = vmul.f32 0.6931472, %v2367_v19  ;;  %v1566_v48 = vmax.f32 %v2086_v17, 2.220446e-16 }
 0x24a   :  { %v2088_v52 = vpop.f32.mrf.mxu1 }
 0x24b   :  { %2374 = vlog2.f32 %v1566_v48  ;;  %v2089_v39 = vadd.f32 %v2088_v52, %v2087_v4  ;;  %2139 = vmatprep.mubr.msk.f32.mxu0 %vm1606_vm2, %v1589_v57 }
 0x24c   :  { %v2369_v56 = vpop.eup %2368 }
 0x24d   :  { %v1591_v8 = vmul.f32 0.6931472, %v2369_v56  ;;  %v1567_v24 = vmax.f32 %v2089_v39, 2.220446e-16 }
 0x24f   :  { %2376 = vlog2.f32 %v1567_v24  ;;  %2140 = vmatmul.mubr.msk.f32.gmra.mxu0 %vm1606_vm2, %v1591_v8 }
 0x250   :  { %v2371_v0 = vpop.eup %2370 }
 0x251   :  { %v1593_v26 = vmul.f32 0.6931472, %v2371_v0 }
 0x253   :  { %2142 = vmatprep.mubr.msk.f32.mxu0 %vm1606_vm2, %v1593_v26 }
 0x254   :  { %v2373_v21 = vpop.eup %2372 }
 0x255   :  { %v1595_v12 = vmul.f32 0.6931472, %v2373_v21 }
 0x257   :  { %2143 = vmatmul.mubr.msk.f32.gmra.mxu0 %vm1606_vm2, %v1595_v12 }
 0x258   :  { %v2375_v3 = vpop.eup %2374 }
 0x259   :  { %v1597_v23 = vmul.f32 0.6931472, %v2375_v3 }
 0x25b   :  { %2145 = vmatprep.mubr.msk.f32.mxu0 %vm1606_vm2, %v1597_v23 }
 0x25c   :  { %v2377_v54 = vpop.eup %2376 }
 0x25d   :  { %v1599_v63 = vmul.f32 0.6931472, %v2377_v54 }
 0x25f   :  { %2146 = vmatmul.mubr.msk.f32.gmra.mxu0 %vm1606_vm2, %v1599_v63 }
 0x2e7   :  { %v2126_v25 = vpop.f32.mrf.mxu0 }
 0x2e9   :  { %v1725_v59 = vpop.f32.mrf.mxu0 }
 0x2ea   :  { %1804 = vxpose.xlu0.b32.start [1/16] (narrow) %v1725_v59, 40 }
 0x2ee   :  { %1805 = vxpose.xlu0.b32.cont [2/16] (narrow) %v2126_v25, 40 }
 0x2ef   :  { %v2129_v35 = vpop.f32.mrf.mxu0 }
 0x2f1   :  { %v1735_v51 = vpop.f32.mrf.mxu0 }
 0x2f2   :  { %1806 = vxpose.xlu0.b32.cont [3/16] (narrow) %v1735_v51, 40 }
 0x2f6   :  { %1807 = vxpose.xlu0.b32.cont [4/16] (narrow) %v2129_v35, 40 }
 0x2f7   :  { %v2132_v28 = vpop.f32.mrf.mxu0 }
 0x2f9   :  { %v1745_v46 = vpop.f32.mrf.mxu0 }
 0x2fa   :  { %1808 = vxpose.xlu0.b32.cont [5/16] (narrow) %v1745_v46, 40 }
 0x2fe   :  { %1809 = vxpose.xlu0.b32.cont [6/16] (narrow) %v2132_v28, 40 }
 0x2ff   :  { %v2135_v32 = vpop.f32.mrf.mxu0 }
 0x301   :  { %v1755_v34 = vpop.f32.mrf.mxu0 }
 0x302   :  { %1810 = vxpose.xlu0.b32.cont [7/16] (narrow) %v1755_v34, 40 }
 0x306   :  { %1811 = vxpose.xlu0.b32.cont [8/16] (narrow) %v2135_v32, 40 }
 0x307   :  { %v2138_v49 = vpop.f32.mrf.mxu0 }
 0x309   :  { %v1765_v50 = vpop.f32.mrf.mxu0 }
 0x30a   :  { %1812 = vxpose.xlu0.b32.cont [9/16] (narrow) %v1765_v50, 40 }
 0x30e   :  { %1813 = vxpose.xlu0.b32.cont [10/16] (narrow) %v2138_v49, 40 }
 0x30f   :  { %v2141_v10 = vpop.f32.mrf.mxu0 }
 0x311   :  { %v1775_v29 = vpop.f32.mrf.mxu0 }
 0x312   :  { %1814 = vxpose.xlu0.b32.cont [11/16] (narrow) %v1775_v29, 40 }
 0x316   :  { %1815 = vxpose.xlu0.b32.cont [12/16] (narrow) %v2141_v10, 40 }
 0x317   :  { %v2144_v37 = vpop.f32.mrf.mxu0 }
 0x319   :  { %v1785_v33 = vpop.f32.mrf.mxu0 }
 0x31a   :  { %1816 = vxpose.xlu0.b32.cont [13/16] (narrow) %v1785_v33, 40 }
 0x31e   :  { %1817 = vxpose.xlu0.b32.cont [14/16] (narrow) %v2144_v37, 40 }
 0x31f   :  { %v2147_v42 = vpop.f32.mrf.mxu0 }
 0x321   :  { %v1795_v53 = vpop.f32.mrf.mxu0 }
 0x322   :  { %1818 = vxpose.xlu0.b32.cont [15/16] (narrow) %v1795_v53, 40 }
 0x326   :  { %1819 = vxpose.xlu0.b32.end [16/16] (narrow) %v2147_v42, 40 }
 0x366   :  { %v1820_v62 = vpop.trf.xlu0 }
 0x367   :  { %1836 = vst [vmem:[%s3225_s4] sm:$0xff] %v1820_v62 }
 0x36a   :  { %v1821_v45 = vpop.trf.xlu0 }
 0x36b   :  { %1837 = vst [vmem:[%s3225_s4 + $0x8] sm:$0xff] %v1821_v45 }
 0x36e   :  { %v1822_v13 = vpop.trf.xlu0 }
 0x36f   :  { %1838 = vst [vmem:[%s3225_s4 + $0x10] sm:$0xff] %v1822_v13 }
 0x372   :  { %v1823_v14 = vpop.trf.xlu0 }
 0x373   :  { %1839 = vst [vmem:[%s3225_s4 + $0x18] sm:$0xff] %v1823_v14 }
 0x376   :  { %v1824_v40 = vpop.trf.xlu0 }
 0x377   :  { %1840 = vst [vmem:[%s3225_s4 + $0x20] sm:$0xff] %v1824_v40 }

</bundles_post_ra>
